<compile_context>
chip_gen: v5e
topology: v5e:2x2
jax: 0.10.0
libtpu: 0.0.40
codegen_flags: <defaults>
</compile_context>

<pallas_src>
import jax
import jax.numpy as jnp
from jax.experimental import pallas as pl
from jax.experimental.pallas import tpu as pltpu

B = 256          # batch (rows), tiled over the grid
D = 32           # observation dim
H = 32           # hidden dim
A = 16           # number of discrete actions
B_TILE = 128     # rows per grid step (multiple of 8 for f32 sublanes)
OUT_LANES = 128  # lane-dense packed output: [action, logprob, entropy, value, 0, ...]


def policy_kernel(x_ref, g_ref, w1_ref, b1_ref, wh_ref, bh_ref, out_ref):
    x = x_ref[...]                                                    # [Bt, D]

    # --- encoder: hidden = relu(x @ W1 + b1) -----------------------
    h = jnp.dot(x, w1_ref[...], preferred_element_type=jnp.float32) + b1_ref[...]
    h = jnp.maximum(h, 0.0)                                           # [Bt, H]

    # --- fused actor + value head: one MXU pass --------------------
    head = jnp.dot(h, wh_ref[...], preferred_element_type=jnp.float32) + bh_ref[...]  # [Bt, A+1]
    logits = head[:, :A]                                              # [Bt, A]
    value = head[:, A:A + 1]                                          # [Bt, 1]

    # --- log-softmax with a single exp pass ------------------------
    m = jnp.max(logits, axis=-1, keepdims=True)
    z = logits - m
    ez = jnp.exp(z)
    s = jnp.sum(ez, axis=-1, keepdims=True)
    log_s = jnp.log(s)
    logp = z - log_s                                                  # normalized logits

    # entropy = -sum(p * logp) = log(s) - sum(ez * z) / s   (reuses ez, no 2nd exp)
    ent = log_s - jnp.sum(ez * z, axis=-1, keepdims=True) / s         # [Bt, 1]

    # --- sample ~ Categorical(logits) via Gumbel-max ----------------
    # g_ref holds precomputed Gumbel(0,1) noise (fresh per call via jax.random;
    # equivalent to torch.multinomial advancing global RNG state).
    perturbed = logp + g_ref[...]
    pm = jnp.max(perturbed, axis=-1, keepdims=True)
    iota = jax.lax.broadcasted_iota(jnp.int32, perturbed.shape, 1)    # [Bt, A]
    idx = jnp.min(jnp.where(perturbed == pm, iota, A), axis=-1, keepdims=True)  # [Bt, 1]

    # --- logprob = normalized logits gathered at the sampled action -
    onehot = (iota == idx).astype(jnp.float32)
    lp_a = jnp.sum(logp * onehot, axis=-1, keepdims=True)             # [Bt, 1]

    # --- pack everything into one lane-dense output slab ------------
    lane = jax.lax.broadcasted_iota(jnp.int32, out_ref.shape, 1)      # [Bt, OUT_LANES]
    packed = jnp.where(lane == 0, idx.astype(jnp.float32),
             jnp.where(lane == 1, lp_a,
             jnp.where(lane == 2, ent,
             jnp.where(lane == 3, value, 0.0))))
    out_ref[...] = packed


@jax.jit
def get_action_and_value(x, params, key):
    w1, b1, wh, bh = params
    b = x.shape[0]
    # Gumbel(0,1) noise for the categorical sample (drawn outside the kernel;
    # pltpu.prng_* has no CPU/interpret lowering and is unnecessary here).
    g = jax.random.gumbel(key, (b, A), jnp.float32)

    out = pl.pallas_call(
        policy_kernel,
        out_shape=jax.ShapeDtypeStruct((b, OUT_LANES), jnp.float32),
        grid=(b // B_TILE,),
        in_specs=[
            pl.BlockSpec((B_TILE, D), lambda i: (i, 0)),      # observations
            pl.BlockSpec((B_TILE, A), lambda i: (i, 0)),      # gumbel noise
            pl.BlockSpec((D, H), lambda i: (0, 0)),           # W1 (VMEM-resident)
            pl.BlockSpec((1, H), lambda i: (0, 0)),           # b1
            pl.BlockSpec((H, A + 1), lambda i: (0, 0)),       # fused head [W2 | wv]
            pl.BlockSpec((1, A + 1), lambda i: (0, 0)),       # fused bias [b2 | bv]
        ],
        out_specs=pl.BlockSpec((B_TILE, OUT_LANES), lambda i: (i, 0)),
        compiler_params=pltpu.CompilerParams(
            dimension_semantics=("parallel",)),               # both v7x TCs take batch tiles
    )(x, g, w1, b1, wh, bh)

    # Unpack the lane-dense slab (matches PyTorch Policy.forward, discrete case):
    action = out[:, 0].astype(jnp.int32)    # [B]
    logprob = out[:, 1]                     # [B]
    entropy = out[:, 2]                     # [B]
    value = out[:, 3:4]                     # [B, 1]
    return action, logprob, entropy, value


def init_params(key):
    k1, k2, k3 = jax.random.split(key, 3)
    w1 = jax.random.normal(k1, (D, H), jnp.float32) / jnp.sqrt(D)
    b1 = jnp.zeros((1, H), jnp.float32)
    w2 = jax.random.normal(k2, (H, A), jnp.float32) / jnp.sqrt(H)
    b2 = jnp.zeros((1, A), jnp.float32)
    wv = jax.random.normal(k3, (H, 1), jnp.float32) / jnp.sqrt(H)
    bv = jnp.zeros((1, 1), jnp.float32)
    # Fuse the value head as the extra column of the actor head (rides the same MXU pass).
    wh = jnp.concatenate([w2, wv], axis=1)   # [H, A+1]
    bh = jnp.concatenate([b2, bv], axis=1)   # [1, A+1]
    return (w1, b1, wh, bh)


def _reference(x, params, g):
    """Pure-JAX reference of the same forward pass (for correctness check)."""
    w1, b1, wh, bh = params
    h = jnp.maximum(
        jnp.dot(x, w1, precision=jax.lax.Precision.HIGHEST) + b1, 0.0)
    head = jnp.dot(h, wh, precision=jax.lax.Precision.HIGHEST) + bh
    logits = head[:, :A]
    value = head[:, A:A + 1]
    logp = jax.nn.log_softmax(logits, axis=-1)
    ent = -jnp.sum(jnp.exp(logp) * logp, axis=-1)
    action = jnp.argmax(logp + g, axis=-1)
    return logp, ent, value, action


if __name__ == "__main__":
    key = jax.random.PRNGKey(0)
    kx, kp, ks = jax.random.split(key, 3)
    x = jax.random.normal(kx, (B, D), jnp.float32)
    params = init_params(kp)

    action, logprob, entropy, value = get_action_and_value(x, params, ks)
    jax.block_until_ready((action, logprob, entropy, value))

    # shape / range checks (PyTorch Policy.forward discrete-case return shapes)
    assert action.shape == (B,) and action.dtype == jnp.int32
    assert logprob.shape == (B,) and entropy.shape == (B,)
    assert value.shape == (B, 1)
    assert bool(jnp.all(action >= 0)) and bool(jnp.all(action < A))
    assert bool(jnp.all(logprob <= 0.0))
    assert bool(jnp.all(entropy >= -1e-4))

    # numerical check against a pure-JAX reference (same Gumbel noise)
    g = jax.random.gumbel(ks, (B, A), jnp.float32)
    ref_logp, ref_ent, ref_val, _ = _reference(x, params, g)
    ref_lp_at_action = jnp.take_along_axis(ref_logp, action[:, None], axis=-1)[:, 0]
    assert bool(jnp.allclose(value, ref_val, atol=1e-3, rtol=1e-3))
    assert bool(jnp.allclose(entropy, ref_ent, atol=1e-3, rtol=1e-3))
    assert bool(jnp.allclose(logprob, ref_lp_at_action, atol=1e-3, rtol=1e-3))

    print("KERNEL_OK")
</pallas_src>

<mosaic_0001>
module attributes {stable_mosaic.version = 11 : i64} {
  func.func @policy_kernel(%arg0: i32, %arg1: memref<128x32xf32, #tpu.memory_space<vmem>>, %arg2: memref<128x16xf32, #tpu.memory_space<vmem>>, %arg3: memref<32x32xf32, #tpu.memory_space<vmem>>, %arg4: memref<1x32xf32, #tpu.memory_space<vmem>>, %arg5: memref<32x17xf32, #tpu.memory_space<vmem>>, %arg6: memref<1x17xf32, #tpu.memory_space<vmem>>, %arg7: memref<128x128xf32, #tpu.memory_space<vmem>>) attributes {dimension_semantics = [#tpu.dimension_semantics<parallel>], iteration_bounds = array<i64: 2>, scalar_prefetch = 0 : i64, scratch_operands = 0 : i64, tpu.core_type = #tpu.core_type<tc>, window_params = [{transform_indices = @transform_0, window_bounds = array<i64: 128, 32>}, {transform_indices = @transform_1, window_bounds = array<i64: 128, 16>}, {pipeline_mode = #tpu.pipeline_mode<synchronous>, transform_indices = @transform_2, window_bounds = array<i64: 32, 32>}, {pipeline_mode = #tpu.pipeline_mode<synchronous>, transform_indices = @transform_3, window_bounds = array<i64: 1, 32>}, {pipeline_mode = #tpu.pipeline_mode<synchronous>, transform_indices = @transform_4, window_bounds = array<i64: 32, 17>}, {pipeline_mode = #tpu.pipeline_mode<synchronous>, transform_indices = @transform_5, window_bounds = array<i64: 1, 17>}, {transform_indices = @transform_6, window_bounds = array<i64: 128, 128>}]} {
    %c0 = arith.constant 0 : index
    %c0_0 = arith.constant 0 : index
    %0 = vector.load %arg1[%c0, %c0_0] : memref<128x32xf32, #tpu.memory_space<vmem>>, vector<128x32xf32>
    %c0_1 = arith.constant 0 : index
    %c0_2 = arith.constant 0 : index
    %1 = vector.load %arg3[%c0_1, %c0_2] : memref<32x32xf32, #tpu.memory_space<vmem>>, vector<32x32xf32>
    %cst = arith.constant dense<0.000000e+00> : vector<128x32xf32>
    %2 = tpu.matmul %0, %1, %cst {dimension_numbers = #tpu.dot_dimension_numbers<[1], [0], [0], [1], [0, 0, 1, 1], [], []>} : vector<128x32xf32>, vector<32x32xf32>, vector<128x32xf32> -> vector<128x32xf32>
    %c0_3 = arith.constant 0 : index
    %c0_4 = arith.constant 0 : index
    %3 = vector.load %arg4[%c0_3, %c0_4] : memref<1x32xf32, #tpu.memory_space<vmem>>, vector<1x32xf32>
    %4 = vector.broadcast %3 : vector<1x32xf32> to vector<128x32xf32>
    %5 = arith.addf %2, %4 : vector<128x32xf32>
    %cst_5 = arith.constant 0.000000e+00 : f32
    %6 = vector.broadcast %cst_5 : f32 to vector<128x32xf32>
    %7 = arith.maximumf %5, %6 : vector<128x32xf32>
    %c0_6 = arith.constant 0 : index
    %c0_7 = arith.constant 0 : index
    %8 = vector.load %arg5[%c0_6, %c0_7] : memref<32x17xf32, #tpu.memory_space<vmem>>, vector<32x17xf32>
    %cst_8 = arith.constant dense<0.000000e+00> : vector<128x17xf32>
    %9 = tpu.matmul %7, %8, %cst_8 {dimension_numbers = #tpu.dot_dimension_numbers<[1], [0], [0], [1], [0, 0, 1, 1], [], []>} : vector<128x32xf32>, vector<32x17xf32>, vector<128x17xf32> -> vector<128x17xf32>
    %c0_9 = arith.constant 0 : index
    %c0_10 = arith.constant 0 : index
    %10 = vector.load %arg6[%c0_9, %c0_10] : memref<1x17xf32, #tpu.memory_space<vmem>>, vector<1x17xf32>
    %11 = vector.broadcast %10 : vector<1x17xf32> to vector<128x17xf32>
    %12 = arith.addf %9, %11 : vector<128x17xf32>
    %13 = vector.extract_strided_slice %12 {offsets = [0, 0], sizes = [128, 16], strides = [1, 1]} : vector<128x17xf32> to vector<128x16xf32>
    %14 = vector.extract_strided_slice %12 {offsets = [0, 16], sizes = [128, 1], strides = [1, 1]} : vector<128x17xf32> to vector<128x1xf32>
    %cst_11 = arith.constant dense<0xFF800000> : vector<128xf32>
    %15 = vector.multi_reduction <maximumf>, %13, %cst_11 [1] : vector<128x16xf32> to vector<128xf32>
    %16 = vector.shape_cast %15 : vector<128xf32> to vector<128x1xf32>
    %17 = vector.broadcast %16 : vector<128x1xf32> to vector<128x16xf32>
    %18 = arith.subf %13, %17 : vector<128x16xf32>
    %19 = math.exp %18 : vector<128x16xf32>
    %cst_12 = arith.constant dense<0.000000e+00> : vector<128xf32>
    %20 = vector.multi_reduction <add>, %19, %cst_12 [1] : vector<128x16xf32> to vector<128xf32>
    %21 = vector.shape_cast %20 : vector<128xf32> to vector<128x1xf32>
    %22 = math.log %21 : vector<128x1xf32>
    %23 = vector.broadcast %22 : vector<128x1xf32> to vector<128x16xf32>
    %24 = arith.subf %18, %23 : vector<128x16xf32>
    %25 = arith.mulf %19, %18 : vector<128x16xf32>
    %cst_13 = arith.constant dense<0.000000e+00> : vector<128xf32>
    %26 = vector.multi_reduction <add>, %25, %cst_13 [1] : vector<128x16xf32> to vector<128xf32>
    %27 = vector.shape_cast %26 : vector<128xf32> to vector<128x1xf32>
    %28 = arith.divf %27, %21 : vector<128x1xf32>
    %29 = arith.subf %22, %28 : vector<128x1xf32>
    %c0_14 = arith.constant 0 : index
    %c0_15 = arith.constant 0 : index
    %30 = vector.load %arg2[%c0_14, %c0_15] : memref<128x16xf32, #tpu.memory_space<vmem>>, vector<128x16xf32>
    %31 = arith.addf %24, %30 : vector<128x16xf32>
    %cst_16 = arith.constant dense<0xFF800000> : vector<128xf32>
    %32 = vector.multi_reduction <maximumf>, %31, %cst_16 [1] : vector<128x16xf32> to vector<128xf32>
    %33 = vector.shape_cast %32 : vector<128xf32> to vector<128x1xf32>
    %34 = tpu.iota {dimensions = array<i32: 1>} : vector<128x16xi32>
    %35 = vector.broadcast %33 : vector<128x1xf32> to vector<128x16xf32>
    %36 = arith.cmpf oeq, %31, %35 : vector<128x16xf32>
    %c16_i32 = arith.constant 16 : i32
    %37 = vector.broadcast %c16_i32 : i32 to vector<128x16xi32>
    %38 = arith.select %36, %34, %37 : vector<128x16xi1>, vector<128x16xi32>
    %cst_17 = arith.constant dense<2147483647> : vector<128xi32>
    %39 = vector.multi_reduction <minsi>, %38, %cst_17 [1] : vector<128x16xi32> to vector<128xi32>
    %40 = vector.shape_cast %39 : vector<128xi32> to vector<128x1xi32>
    %41 = vector.broadcast %40 : vector<128x1xi32> to vector<128x16xi32>
    %42 = arith.cmpi eq, %34, %41 : vector<128x16xi32>
    %43 = arith.extui %42 : vector<128x16xi1> to vector<128x16xi32>
    %44 = arith.sitofp %43 : vector<128x16xi32> to vector<128x16xf32>
    %45 = arith.mulf %24, %44 : vector<128x16xf32>
    %cst_18 = arith.constant dense<0.000000e+00> : vector<128xf32>
    %46 = vector.multi_reduction <add>, %45, %cst_18 [1] : vector<128x16xf32> to vector<128xf32>
    %47 = vector.shape_cast %46 : vector<128xf32> to vector<128x1xf32>
    %48 = tpu.iota {dimensions = array<i32: 1>} : vector<128x128xi32>
    %c0_i32 = arith.constant 0 : i32
    %49 = vector.broadcast %c0_i32 : i32 to vector<128x128xi32>
    %50 = arith.cmpi eq, %48, %49 : vector<128x128xi32>
    %51 = arith.sitofp %40 : vector<128x1xi32> to vector<128x1xf32>
    %c1_i32 = arith.constant 1 : i32
    %52 = vector.broadcast %c1_i32 : i32 to vector<128x128xi32>
    %53 = arith.cmpi eq, %48, %52 : vector<128x128xi32>
    %c2_i32 = arith.constant 2 : i32
    %54 = vector.broadcast %c2_i32 : i32 to vector<128x128xi32>
    %55 = arith.cmpi eq, %48, %54 : vector<128x128xi32>
    %c3_i32 = arith.constant 3 : i32
    %56 = vector.broadcast %c3_i32 : i32 to vector<128x128xi32>
    %57 = arith.cmpi eq, %48, %56 : vector<128x128xi32>
    %cst_19 = arith.constant 0.000000e+00 : f32
    %58 = vector.shape_cast %14 : vector<128x1xf32> to vector<128x1xf32>
    %59 = vector.broadcast %58 : vector<128x1xf32> to vector<128x128xf32>
    %60 = vector.broadcast %cst_19 : f32 to vector<128x128xf32>
    %61 = arith.select %57, %59, %60 : vector<128x128xi1>, vector<128x128xf32>
    %62 = vector.shape_cast %29 : vector<128x1xf32> to vector<128x1xf32>
    %63 = vector.broadcast %62 : vector<128x1xf32> to vector<128x128xf32>
    %64 = arith.select %55, %63, %61 : vector<128x128xi1>, vector<128x128xf32>
    %65 = vector.shape_cast %47 : vector<128x1xf32> to vector<128x1xf32>
    %66 = vector.broadcast %65 : vector<128x1xf32> to vector<128x128xf32>
    %67 = arith.select %53, %66, %64 : vector<128x128xi1>, vector<128x128xf32>
    %68 = vector.shape_cast %51 : vector<128x1xf32> to vector<128x1xf32>
    %69 = vector.broadcast %68 : vector<128x1xf32> to vector<128x128xf32>
    %70 = arith.select %50, %69, %67 : vector<128x128xi1>, vector<128x128xf32>
    %c0_20 = arith.constant 0 : index
    %c0_21 = arith.constant 0 : index
    %71 = vector.load %arg7[%c0_20, %c0_21] : memref<128x128xf32, #tpu.memory_space<vmem>>, vector<128x128xf32>
    tpu.vector_store %arg7[%c0_20, %c0_21], %70 {strides = array<i32>} : memref<128x128xf32, #tpu.memory_space<vmem>>, vector<128x128xf32>,
    return
  }
  func.func @transform_0(%arg0: i32) -> (i32, i32) {
    %c0_i32 = arith.constant 0 : i32
    %c0_i32_0 = arith.constant 0 : i32
    return %arg0, %c0_i32 : i32, i32
  }
  func.func @transform_1(%arg0: i32) -> (i32, i32) {
    %c0_i32 = arith.constant 0 : i32
    %c0_i32_0 = arith.constant 0 : i32
    return %arg0, %c0_i32 : i32, i32
  }
  func.func @transform_2(%arg0: i32) -> (i32, i32) {
    %c0_i32 = arith.constant 0 : i32
    %c0_i32_0 = arith.constant 0 : i32
    %c0_i32_1 = arith.constant 0 : i32
    return %c0_i32, %c0_i32_0 : i32, i32
  }
  func.func @transform_3(%arg0: i32) -> (i32, i32) {
    %c0_i32 = arith.constant 0 : i32
    %c0_i32_0 = arith.constant 0 : i32
    %c0_i32_1 = arith.constant 0 : i32
    return %c0_i32, %c0_i32_0 : i32, i32
  }
  func.func @transform_4(%arg0: i32) -> (i32, i32) {
    %c0_i32 = arith.constant 0 : i32
    %c0_i32_0 = arith.constant 0 : i32
    %c0_i32_1 = arith.constant 0 : i32
    return %c0_i32, %c0_i32_0 : i32, i32
  }
  func.func @transform_5(%arg0: i32) -> (i32, i32) {
    %c0_i32 = arith.constant 0 : i32
    %c0_i32_0 = arith.constant 0 : i32
    %c0_i32_1 = arith.constant 0 : i32
    return %c0_i32, %c0_i32_0 : i32, i32
  }
  func.func @transform_6(%arg0: i32) -> (i32, i32) {
    %c0_i32 = arith.constant 0 : i32
    %c0_i32_0 = arith.constant 0 : i32
    return %arg0, %c0_i32 : i32, i32
  }
}

</mosaic_0001>

<bundles_post_ra>
// kernel: get_action_and_value.1
= control target key start
LH: loop header
LB: loop body
LE: loop exit
PB: predicated region body
PF: predicated region fallthrough
CT: control target
= control target key end

     0   :  { %s2004_s21 = smov 0   ;;  %s3311_s0 = inlined_call_operand.vmem [shape: f32[256,32], index: 0, kind: input, shape index: {}]   ;;  %s3312_s1 = inlined_call_operand.vmem [shape: f32[256,16], index: 1, kind: input, shape index: {}]   ;;  %s3313_s2 = inlined_call_operand.vmem [shape: f32[32,32], index: 2, kind: input, shape index: {}]   ;;  %s3314_s3 = inlined_call_operand.vmem [shape: f32[1,32], index: 3, kind: input, shape index: {}]   ;;  %s3315_s4 = inlined_call_operand.vmem [shape: f32[32,17], index: 4, kind: input, shape index: {}]   ;;  %s3316_s5 = inlined_call_operand.vmem [shape: f32[1,17], index: 5, kind: input, shape index: {}]   ;;  %s3317_s6 = inlined_call_operand.vmem [shape: f32[256,128], index: 6, kind: output, shape index: {}]  }
   0x1 LB: > { %s1779_s22 = sadd.s32 4294967295, %s1965_s21   ;;  %p1783_p0 = scmp.ge.s32.totalorder %s1965_s21, 1  ;;  %s1965_s21 = sphi %s2004_s21, %s16_s21  }
   0x2   : > { %p224_p1 = scmp.lt.s32.totalorder %s1965_s21, 3 }
   0x4   : > { %p225_p2 = pnand %p1783_p0, %p224_p1 }
   0x6   : > { %228 = sbr.rel (%p225_p2) target bundleno = 1312 (0x520), region = 44 }
   0xb   : > { %v296_v0 = vld [vmem:[%s3313_s2 + $0x18] sm:$0xff]  ;;  %v295_v1 = vld [vmem:[%s3313_s2 + $0x10] sm:$0xff]  ;;  %s1784_s27 = sshll.u32 %s1779_s22, 4  ;;  %v294_v2 = vld [vmem:[%s3313_s2 + $0x8] sm:$0xff]  ;;  %vm301_vm0 = vcmask 261120   ;;  %v1967_v61 = vmov 16  }
   0xc   : > { %362 = vmatpush.msra.mxu0 %v296_v0  ;;  %1840 = vmatpush.msra.mxu2 %v296_v0  ;;  %p260_p3 = scmp.lt.s32.totalorder %s1784_s27, 31  ;;  %v293_v3 = vld [vmem:[%s3313_s2] sm:$0xff]  ;;  %v434_v10 = vld [vmem:[%s3315_s4 + $0x18] sm:$0xff]  ;;  %v433_v17 = vld [vmem:[%s3315_s4 + $0x10] sm:$0xff]  ;;  %vm552_vm1 = vcmask 130048  }
   0xd   : > { %499 = vmatpush.msra.mxu1 %v434_v10  ;;  %1844 = vmatpush.msra.mxu3 %v434_v10  ;;  %v432_v18 = vld [vmem:[%s3315_s4 + $0x8] sm:$0xff]  ;;  %v431_v20 = vld [vmem:[%s3315_s4] sm:$0xff] }
   0xe   : > { %363 = vmatpush.msra.mxu0 %v295_v1  ;;  %1841 = vmatpush.msra.mxu2 %v295_v1  ;;  %s3381_s27 = smov (!%p260_p3, %s1784_s27), 31  ;;  %v2079_v24 = vld [vmem:[%s3314_s3] ss:$0 sm:$0xff] }
   0xf   : > { %s2024_s8 = sshll.u32 %s3381_s27, 3  ;;  %500 = vmatpush.msra.mxu1 %v433_v17  ;;  %1845 = vmatpush.msra.mxu3 %v433_v17  ;;  %v2116_v10 = vld [vmem:[%s3316_s5] ss:$0 sm:$0xff] }
  0x10   : > { %364 = vmatpush.msra.mxu0 %v294_v2  ;;  %1842 = vmatpush.msra.mxu2 %v294_v2  ;;  %s2030_s11 = scalar_lea.vmem %s3311_s0, %s2024_s8  ;;  %s2395_s27 = scalar_lea.vmem %s3312_s1, %s2024_s8 }
  0x11   : > { %v277_v4 = vld [vmem:[%s2030_s11] sm:$0xff]  ;;  %v278_v6 = vld [vmem:[%s2030_s11 + $0x8] sm:$0xff]  ;;  %v279_v8 = vld [vmem:[%s2030_s11 + $0x10] sm:$0xff]  ;;  %501 = vmatpush.msra.mxu1 %v432_v18  ;;  %1846 = vmatpush.msra.mxu3 %v432_v18  ;;  %s3163_s30 = scalar_lea.vmem %s3317_s6, %s2024_s8 }
  0x12   : > { %365 = vmatpush.msra.mxu0 %v293_v3  ;;  %1843 = vmatpush.msra.mxu2 %v293_v3  ;;  %v285_v5 = vld [vmem:[%s2030_s11 + $0x40] sm:$0xff]  ;;  %v286_v7 = vld [vmem:[%s2030_s11 + $0x48] sm:$0xff]  ;;  %v287_v9 = vld [vmem:[%s2030_s11 + $0x50] sm:$0xff] }
  0x13   : > { %1790 = vmatmul.msk.f32.vlgmr.msra.gmra.mxu0 %vm301_vm0, %v277_v4  ;;  %1798 = vmatmul.msk.f32.vlgmr.msra.gmra.mxu2 %vm301_vm0, %v285_v5  ;;  %v280_v11 = vld [vmem:[%s2030_s11 + $0x18] sm:$0xff]  ;;  %v289_v13 = vld [vmem:[%s2030_s11 + $0x60] sm:$0xff]  ;;  %v282_v15 = vld [vmem:[%s2030_s11 + $0x28] sm:$0xff] }
  0x14   : > { %v288_v12 = vld [vmem:[%s2030_s11 + $0x58] sm:$0xff]  ;;  %v281_v14 = vld [vmem:[%s2030_s11 + $0x20] sm:$0xff]  ;;  %v283_v16 = vld [vmem:[%s2030_s11 + $0x30] sm:$0xff]  ;;  %502 = vmatpush.msra.mxu1 %v431_v20  ;;  %1847 = vmatpush.msra.mxu3 %v431_v20 }
  0x15   : > { %v290_v19 = vld [vmem:[%s2030_s11 + $0x68] sm:$0xff]  ;;  %v291_v21 = vld [vmem:[%s2030_s11 + $0x70] sm:$0xff]  ;;  %v292_v22 = vld [vmem:[%s2030_s11 + $0x78] sm:$0xff]  ;;  %1858 = vset.pattern.permute.xlu1 %v1967_v61  ;;  %1859 = vset.pattern.permute.xlu2 %v1967_v61 }
  0x16   : > { %v284_v23 = vld [vmem:[%s2030_s11 + $0x38] sm:$0xff]  ;;  %1860 = vset.pattern.permute.xlu0 %v1967_v61 }
  0x1b   : > { %1791 = vmatmul.msk.f32.gmra.mxu0 %vm301_vm0, %v278_v6  ;;  %1799 = vmatmul.msk.f32.gmra.mxu2 %vm301_vm0, %v286_v7 }
  0x23   : > { %1792 = vmatmul.msk.f32.gmra.mxu0 %vm301_vm0, %v279_v8  ;;  %1800 = vmatmul.msk.f32.gmra.mxu2 %vm301_vm0, %v287_v9 }
  0x2b   : > { %1793 = vmatmul.msk.f32.gmra.mxu0 %vm301_vm0, %v280_v11  ;;  %1801 = vmatmul.msk.f32.gmra.mxu2 %vm301_vm0, %v288_v12 }
  0x33   : > { %1802 = vmatmul.msk.f32.gmra.mxu2 %vm301_vm0, %v289_v13  ;;  %1794 = vmatmul.msk.f32.gmra.mxu0 %vm301_vm0, %v281_v14 }
  0x3b   : > { %1795 = vmatmul.msk.f32.gmra.mxu0 %vm301_vm0, %v282_v15  ;;  %1803 = vmatmul.msk.f32.gmra.mxu2 %vm301_vm0, %v290_v19 }
  0x43   : > { %1796 = vmatmul.msk.f32.gmra.mxu0 %vm301_vm0, %v283_v16  ;;  %1804 = vmatmul.msk.f32.gmra.mxu2 %vm301_vm0, %v291_v21 }
  0x4b   : > { %1805 = vmatmul.msk.f32.gmra.mxu2 %vm301_vm0, %v292_v22  ;;  %1797 = vmatmul.msk.f32.gmra.mxu0 %vm301_vm0, %v284_v23 }
  0x90   : > { %v367_v25 = vpop.f32.mrf.mxu0 }
  0x91   : > { %v368_v26 = vadd.f32 %v2079_v24, %v367_v25 }
  0x93   : > { %v415_v27 = vmax.f32 %v368_v26, 0.0 }
  0x95   : > { %1806 = vmatmul.msk.f32.vlgmr.msra.gmra.mxu1 %vm301_vm0, %v415_v27 }
  0x96   : > { %v391_v28 = vpop.f32.mrf.mxu2 }
  0x97   : > { %v392_v29 = vadd.f32 %v2079_v24, %v391_v28 }
  0x98   : > { %v370_v30 = vpop.f32.mrf.mxu0 }
  0x99   : > { %v423_v31 = vmax.f32 %v392_v29, 0.0  ;;  %v371_v32 = vadd.f32 %v2079_v24, %v370_v30 }
  0x9b   : > { %v416_v33 = vmax.f32 %v371_v32, 0.0  ;;  %1814 = vmatmul.msk.f32.vlgmr.msra.gmra.mxu3 %vm301_vm0, %v423_v31 }
  0x9d   : > { %1807 = vmatmul.msk.f32.gmra.mxu1 %vm301_vm0, %v416_v33 }
  0x9e   : > { %v394_v34 = vpop.f32.mrf.mxu2 }
  0x9f   : > { %v395_v35 = vadd.f32 %v2079_v24, %v394_v34 }
  0xa0   : > { %v373_v36 = vpop.f32.mrf.mxu0 }
  0xa1   : > { %v374_v37 = vadd.f32 %v2079_v24, %v373_v36  ;;  %v424_v38 = vmax.f32 %v395_v35, 0.0 }
  0xa3   : > { %v417_v39 = vmax.f32 %v374_v37, 0.0  ;;  %1815 = vmatmul.msk.f32.gmra.mxu3 %vm301_vm0, %v424_v38 }
  0xa5   : > { %1808 = vmatmul.msk.f32.gmra.mxu1 %vm301_vm0, %v417_v39 }
  0xa6   : > { %v397_v40 = vpop.f32.mrf.mxu2 }
  0xa7   : > { %v398_v41 = vadd.f32 %v2079_v24, %v397_v40 }
  0xa8   : > { %v376_v42 = vpop.f32.mrf.mxu0 }
  0xa9   : > { %v377_v43 = vadd.f32 %v2079_v24, %v376_v42  ;;  %v425_v44 = vmax.f32 %v398_v41, 0.0 }
  0xab   : > { %v418_v45 = vmax.f32 %v377_v43, 0.0  ;;  %1816 = vmatmul.msk.f32.gmra.mxu3 %vm301_vm0, %v425_v44 }
  0xad   : > { %1809 = vmatmul.msk.f32.gmra.mxu1 %vm301_vm0, %v418_v45 }
  0xae   : > { %v400_v46 = vpop.f32.mrf.mxu2 }
  0xaf   : > { %v401_v47 = vadd.f32 %v2079_v24, %v400_v46 }
  0xb0   : > { %v379_v48 = vpop.f32.mrf.mxu0 }
  0xb1   : > { %v426_v49 = vmax.f32 %v401_v47, 0.0  ;;  %v380_v50 = vadd.f32 %v2079_v24, %v379_v48 }
  0xb3   : > { %1817 = vmatmul.msk.f32.gmra.mxu3 %vm301_vm0, %v426_v49  ;;  %v419_v51 = vmax.f32 %v380_v50, 0.0 }
  0xb5   : > { %1810 = vmatmul.msk.f32.gmra.mxu1 %vm301_vm0, %v419_v51 }
  0xb6   : > { %v403_v52 = vpop.f32.mrf.mxu2 }
  0xb7   : > { %v404_v53 = vadd.f32 %v2079_v24, %v403_v52 }
  0xb8   : > { %v382_v54 = vpop.f32.mrf.mxu0 }
  0xb9   : > { %v427_v55 = vmax.f32 %v404_v53, 0.0  ;;  %v383_v56 = vadd.f32 %v2079_v24, %v382_v54 }
  0xbb   : > { %1818 = vmatmul.msk.f32.gmra.mxu3 %vm301_vm0, %v427_v55  ;;  %v420_v57 = vmax.f32 %v383_v56, 0.0 }
  0xbd   : > { %1811 = vmatmul.msk.f32.gmra.mxu1 %vm301_vm0, %v420_v57 }
  0xbe   : > { %v406_v62 = vpop.f32.mrf.mxu2 }
  0xbf   : > { %v407_v63 = vadd.f32 %v2079_v24, %v406_v62 }
  0xc0   : > { %v385_v58 = vpop.f32.mrf.mxu0 }
  0xc1   : > { %v386_v59 = vadd.f32 %v2079_v24, %v385_v58  ;;  %v428_v0 = vmax.f32 %v407_v63, 0.0 }
  0xc3   : > { %v421_v60 = vmax.f32 %v386_v59, 0.0  ;;  %1819 = vmatmul.msk.f32.gmra.mxu3 %vm301_vm0, %v428_v0 }
  0xc5   : > { %1812 = vmatmul.msk.f32.gmra.mxu1 %vm301_vm0, %v421_v60 }
  0xc6   : > { %v409_v1 = vpop.f32.mrf.mxu2 }
  0xc7   : > { %v410_v2 = vadd.f32 %v2079_v24, %v409_v1 }
  0xc8   : > { %v388_v4 = vpop.f32.mrf.mxu0 }
  0xc9   : > { %v429_v3 = vmax.f32 %v410_v2, 0.0  ;;  %v389_v5 = vadd.f32 %v2079_v24, %v388_v4 }
  0xcb   : > { %1820 = vmatmul.msk.f32.gmra.mxu3 %vm301_vm0, %v429_v3  ;;  %v422_v7 = vmax.f32 %v389_v5, 0.0 }
  0xcd   : > { %1813 = vmatmul.msk.f32.gmra.mxu1 %vm301_vm0, %v422_v7 }
  0xce   : > { %v412_v6 = vpop.f32.mrf.mxu2 }
  0xcf   : > { %v413_v8 = vadd.f32 %v2079_v24, %v412_v6 }
  0xd1   : > { %v430_v9 = vmax.f32 %v413_v8, 0.0 }
  0xd3   : > { %1821 = vmatmul.msk.f32.gmra.mxu3 %vm301_vm0, %v430_v9 }
 0x112   : > { %v504_v11 = vpop.f32.mrf.mxu1 }
 0x113   : > { %v2119_v12 = vadd.f32 %v2116_v10, %v504_v11 }
 0x115   : > { %1553 = vperm.xlu1 %1858, %v2119_v12   ;;  %v553_v13 = vsel %vm552_vm1, %v2119_v12, -inf }
 0x116   : > { %554 = vmax.xlane.f32.xlu0 %v553_v13 }
 0x11a   : > { %v507_v14 = vpop.f32.mrf.mxu1 }
 0x11b   : > { %v508_v15 = vadd.f32 %v2116_v10, %v507_v14 }
 0x11d   : > { %1558 = vperm.xlu2 %1859, %v508_v15   ;;  %v556_v16 = vsel %vm552_vm1, %v508_v15, -inf }
 0x11e   : > { %v528_v17 = vpop.f32.mrf.mxu3  ;;  %557 = vmax.xlane.f32.xlu0 %v556_v16 }
 0x11f   : > { %v2127_v18 = vadd.f32 %v2116_v10, %v528_v17 }
 0x121   : > { %1593 = vperm.xlu1 %1858, %v2127_v18   ;;  %v577_v23 = vsel %vm552_vm1, %v2127_v18, -inf }
 0x122   : > { %v510_v19 = vpop.f32.mrf.mxu1 }
 0x123   : > { %v2131_v20 = vadd.f32 %v2116_v10, %v510_v19 }
 0x125   : > { %v559_v24 = vsel %vm552_vm1, %v2131_v20, -inf }
 0x126   : > { %v531_v21 = vpop.f32.mrf.mxu3 }
 0x127   : > { %v2135_v22 = vadd.f32 %v2116_v10, %v531_v21 }
 0x129   : > { %v580_v31 = vsel %vm552_vm1, %v2135_v22, -inf }
 0x12a   : > { %v513_v25 = vpop.f32.mrf.mxu1 }
 0x12b   : > { %v2143_v26 = vadd.f32 %v2116_v10, %v513_v25 }
 0x12d   : > { %v562_v27 = vsel %vm552_vm1, %v2143_v26, -inf }
 0x12e   : > { %v534_v28 = vpop.f32.mrf.mxu3 }
 0x12f   : > { %v2148_v29 = vadd.f32 %v2116_v10, %v534_v28 }
 0x131   : > { %v583_v30 = vsel %vm552_vm1, %v2148_v29, -inf }
 0x132   : > { %1563 = vperm.xlu0 %1860, %v2131_v20   ;;  %v516_v33 = vpop.f32.mrf.mxu1 }
 0x133   : > { %v2157_v34 = vadd.f32 %v2116_v10, %v516_v33 }
 0x135   : > { %v565_v41 = vsel %vm552_vm1, %v2157_v34, -inf }
 0x136   : > { %v537_v32 = vpop.f32.mrf.mxu3 }
 0x137   : > { %v2164_v38 = vadd.f32 %v2116_v10, %v537_v32 }
 0x139   : > { %v586_v42 = vsel %vm552_vm1, %v2164_v38, -inf }
 0x13a   : > { %1598 = vperm.xlu0 %1860, %v2135_v22   ;;  %v519_v36 = vpop.f32.mrf.mxu1 }
 0x13b   : > { %v2189_v53 = vadd.f32 %v2116_v10, %v519_v36 }
 0x13e   : > { %v540_v35 = vpop.f32.mrf.mxu3 }
 0x13f   : > { %v2161_v37 = vadd.f32 %v2116_v10, %v540_v35 }
 0x141   : > { %v589_v46 = vsel %vm552_vm1, %v2161_v37, -inf }
 0x142   : > { %v522_v39 = vpop.f32.mrf.mxu1 }
 0x143   : > { %v2169_v40 = vadd.f32 %v2116_v10, %v522_v39 }
 0x145   : > { %v571_v50 = vsel %vm552_vm1, %v2169_v40, -inf }
 0x146   : > { %578 = vmax.xlane.f32.xlu2 %v577_v23  ;;  %v543_v43 = vpop.f32.mrf.mxu3 }
 0x147   : > { %v2183_v49 = vadd.f32 %v2116_v10, %v543_v43 }
 0x149   : > { %3328 = vst [vmem:[#allocation2_spill] sm:$0xff] %v2183_v49  ;;  %v592_v55 = vsel %vm552_vm1, %v2183_v49, -inf }
 0x14a   : > { %v525_v58 = vpop.f32.mrf.mxu1 }
 0x14b   : > { %560 = vmax.xlane.f32.xlu1 %v559_v24  ;;  %v2203_v59 = vadd.f32 %v2116_v10, %v525_v58 }
 0x14d   : > { %v574_v0 = vsel %vm552_vm1, %v2203_v59, -inf }
 0x14e   : > { %v2176_v45 = vpop.f32.mrf.mxu3 }
 0x153   : > { %563 = vmax.xlane.f32.xlu1 %v562_v27 }
 0x156   : > { %v549_v52 = vpop.f32.mrf.mxu3 }
 0x157   : > { %v2192_v54 = vadd.f32 %v2116_v10, %v549_v52 }
 0x159   : > { %3329 = vst [vmem:[#allocation3_spill] sm:$0xff] %v2192_v54  ;;  %v598_v60 = vsel %vm552_vm1, %v2192_v54, -inf }
 0x15b   : > { %584 = vmax.xlane.f32.xlu1 %v583_v30 }
 0x15e   : > { %1568 = vperm.xlu2 %1859, %v2143_v26  }
 0x164   : > { %581 = vmax.xlane.f32.xlu0 %v580_v31  ;;  %v568_v31 = vsel %vm552_vm1, %v2189_v53, -inf }
 0x166   : > { %1603 = vperm.xlu2 %1859, %v2148_v29  }
 0x174   : > { %1573 = vperm.xlu1 %1858, %v2157_v34  }
 0x177   : > { %v2208_v62 = vpop.permute.xlu2 %1558 }
 0x178   : > { %1613 = vperm.xlu0 %1860, %v2161_v37  }
 0x17c   : > { %1608 = vperm.xlu1 %1858, %v2164_v38  }
 0x184   : > { %1583 = vperm.xlu1 %1858, %v2169_v40  }
 0x187   : > { %v2196_v56 = vpop.permute.xlu1 %1553 }
 0x189   : > { %v555_v44 = vpop.xlane.xlu0 %554 }
 0x18a   : > { %v2199_v57 = vsub.f32 %v2119_v12, %v555_v44 }
 0x18c   : > { %v617_v61 = vmul.f32 1.442695, %v2199_v57 }
 0x18f   : > { %566 = vmax.xlane.f32.xlu2 %v565_v41 }
 0x191   : > { %v558_v47 = vpop.xlane.xlu0 %557 }
 0x192   : > { %v2180_v48 = vsub.f32 %v508_v15, %v558_v47 }
 0x193   : > { %v2214_v1 = vpop.permute.xlu1 %1593 }
 0x194   : > { %v619_v51 = vmul.f32 1.442695, %v2180_v48 }
 0x196   : > { %1863 = vpow2.f32 %v619_v51 }
 0x197   : > { %587 = vmax.xlane.f32.xlu2 %v586_v42  ;;  %1865 = vpow2.f32 %v617_v61 }
 0x19c   : > { %v2210_v63 = vpop.eup %1863 }
 0x19d   : > { %v746_v2 = vmul.f32 %v2210_v63, %v2180_v48  ;;  %v2219_v5 = vpop.eup %1865 }
 0x19e   : > { %v649_v8 = vsel %vm552_vm1, %v2219_v5, 0.0 }
 0x19f   : > { %v764_v4 = vsel %vm552_vm1, %v746_v2, 0.0 }
 0x1a2   : > { %590 = vmax.xlane.f32.xlu0 %v589_v46 }
 0x1a4   : > { %v2231_v13 = vpop.permute.xlu0 %1563 }
 0x1aa   : > { %572 = vmax.xlane.f32.xlu0 %v571_v50 }
 0x1ac   : > { %v2238_v23 = vpop.permute.xlu0 %1598 }
 0x1ae   : > { %593 = vmax.xlane.f32.xlu1 %v592_v55 }
 0x1af   : > { %1578 = vperm.xlu2 %1859, %v2189_v53  }
 0x1b2   : > { %599 = vmax.xlane.f32.xlu0 %v598_v60 }
 0x1b6   : > { %575 = vmax.xlane.f32.xlu1 %v574_v0 }
 0x1b9   : > { %v579_v3 = vpop.xlane.xlu2 %578 }
 0x1ba   : > { %v2222_v6 = vsub.f32 %v2127_v18, %v579_v3  ;;  %765 = vadd.xlane.f32.xlu0 %v764_v4  ;;  %v2286_v3 = vadd.f32 %v2116_v10, %v2176_v45  ;;  %v745_v10 = vmul.f32 %v2219_v5, %v2199_v57 }
 0x1bc   : > { %v633_v7 = vmul.f32 1.442695, %v2222_v6 }
 0x1be   : > { %1867 = vpow2.f32 %v633_v7  ;;  %v561_v9 = vpop.xlane.xlu1 %560  ;;  %650 = vadd.xlane.f32.xlu1 %v649_v8  ;;  %v595_v7 = vsel %vm552_vm1, %v2286_v3, -inf }
 0x1bf   : > { %v2228_v11 = vsub.f32 %v2131_v20, %v561_v9 }
 0x1c1   : > { %v621_v12 = vmul.f32 1.442695, %v2228_v11  ;;  %v2262_v44 = vpop.permute.xlu2 %1568 }
 0x1c3   : > { %1869 = vpow2.f32 %v621_v12 }
 0x1c4   : > { %v1868_v14 = vpop.eup %1867 }
 0x1c5   : > { %v673_v15 = vsel %vm552_vm1, %v1868_v14, 0.0  ;;  %v753_v16 = vmul.f32 %v1868_v14, %v2222_v6 }
 0x1c6   : > { %v564_v17 = vpop.xlane.xlu1 %563  ;;  %674 = vadd.xlane.f32.xlu0 %v673_v15  ;;  %v761_v15 = vsel %vm552_vm1, %v745_v10, 0.0 }
 0x1c7   : > { %v785_v18 = vsel %vm552_vm1, %v753_v16, 0.0  ;;  %v2253_v35 = vsub.f32 %v2143_v26, %v564_v17 }
 0x1c8   : > { %786 = vadd.xlane.f32.xlu1 %v785_v18  ;;  %v652_v18 = vsel %vm552_vm1, %v2210_v63, 0.0 }
 0x1c9   : > { %v1870_v19 = vpop.eup %1869  ;;  %v623_v41 = vmul.f32 1.442695, %v2253_v35  ;;  %v2265_v46 = vpop.permute.xlu2 %1603 }
 0x1ca   : > { %v747_v21 = vmul.f32 %v1870_v19, %v2228_v11  ;;  %v655_v20 = vsel %vm552_vm1, %v1870_v19, 0.0 }
 0x1cc   : > { %v767_v27 = vsel %vm552_vm1, %v747_v21, 0.0 }
 0x1ce   : > { %v585_v24 = vpop.xlane.xlu1 %584  ;;  %656 = vadd.xlane.f32.xlu0 %v655_v20 }
 0x1cf   : > { %v2241_v25 = vsub.f32 %v2148_v29, %v585_v24 }
 0x1d0   : > { %768 = vadd.xlane.f32.xlu1 %v767_v27 }
 0x1d1   : > { %v637_v28 = vmul.f32 1.442695, %v2241_v25 }
 0x1d3   : > { %1871 = vpow2.f32 %v637_v28 }
 0x1d7   : > { %v582_v30 = vpop.xlane.xlu0 %581 }
 0x1d8   : > { %v2248_v32 = vsub.f32 %v2135_v22, %v582_v30  ;;  %569 = vmax.xlane.f32.xlu2 %v568_v31 }
 0x1d9   : > { %v2250_v33 = vpop.eup %1871 }
 0x1da   : > { %v635_v29 = vmul.f32 1.442695, %v2248_v32  ;;  %v755_v36 = vmul.f32 %v2250_v33, %v2241_v25 }
 0x1dc   : > { %1873 = vpow2.f32 %v635_v29  ;;  %v791_v39 = vsel %vm552_vm1, %v755_v36, 0.0 }
 0x1dd   : > { %792 = vadd.xlane.f32.xlu0 %v791_v39  ;;  %1875 = vpow2.f32 %v623_v41  ;;  %v679_v39 = vsel %vm552_vm1, %v2250_v33, 0.0 }
 0x1e2   : > { %v1874_v42 = vpop.eup %1873 }
 0x1e3   : > { %v676_v22 = vsel %vm552_vm1, %v1874_v42, 0.0  ;;  %v1876_v43 = vpop.eup %1875  ;;  %v754_v21 = vmul.f32 %v1874_v42, %v2248_v32 }
 0x1e4   : > { %677 = vadd.xlane.f32.xlu1 %v676_v22  ;;  %v658_v26 = vsel %vm552_vm1, %v1876_v43, 0.0  ;;  %v748_v5 = vmul.f32 %v1876_v43, %v2253_v35  ;;  %v1145_v22 = vlaneseq }
 0x1e5   : > { %v788_v20 = vsel %vm552_vm1, %v754_v21, 0.0 }
 0x1e6   : > { %v2281_v2 = vpop.permute.xlu1 %1573  ;;  %v770_v28 = vsel %vm552_vm1, %v748_v5, 0.0 }
 0x1ea   : > { %v2276_v60 = vpop.permute.xlu0 %1613 }
 0x1ec   : > { %659 = vadd.xlane.f32.xlu1 %v658_v26 }
 0x1ee   : > { %v2293_v14 = vpop.permute.xlu1 %1608 }
 0x1f0   : > { %1588 = vperm.xlu2 %1859, %v2203_v59  }
 0x1f6   : > { %v2298_v16 = vpop.permute.xlu1 %1583 }
 0x202   : > { %v567_v47 = vpop.xlane.xlu2 %566 }
 0x203   : > { %v2268_v50 = vsub.f32 %v2157_v34, %v567_v47 }
 0x205   : > { %v625_v51 = vmul.f32 1.442695, %v2268_v50 }
 0x207   : > { %1877 = vpow2.f32 %v625_v51 }
 0x20a   : > { %v588_v52 = vpop.xlane.xlu2 %587 }
 0x20b   : > { %v2272_v55 = vsub.f32 %v2164_v38, %v588_v52 }
 0x20d   : > { %v2274_v58 = vpop.eup %1877  ;;  %v639_v61 = vmul.f32 1.442695, %v2272_v55 }
 0x20e   : > { %v749_v0 = vmul.f32 %v2274_v58, %v2268_v50 }
 0x20f   : > { %1879 = vpow2.f32 %v639_v61  ;;  %v2325_v61 = vand.u32 127, %v1145_v22 }
 0x210   : > { %v773_v34 = vsel %vm552_vm1, %v749_v0, 0.0 }
 0x211   : > { %774 = vadd.xlane.f32.xlu0 %v773_v34  ;;  %vm1550_vm6 = vcmp.eq.s32.totalorder %v2325_v61, 3  ;;  %vm1549_vm7 = vcmp.eq.s32.totalorder %v2325_v61, 2 }
 0x212   : > { %v2320_v43 = vpop.permute.xlu2 %1578 }
 0x215   : > { %v1880_v38 = vpop.eup %1879  ;;  %v591_v4 = vpop.xlane.xlu0 %590 }
 0x216   : > { %v756_v8 = vmul.f32 %v1880_v38, %v2272_v55  ;;  %v682_v9 = vsel %vm552_vm1, %v1880_v38, 0.0  ;;  %v2313_v63 = vsub.f32 %v2161_v37, %v591_v4 }
 0x218   : > { %v794_v12 = vsel %vm552_vm1, %v756_v8, 0.0  ;;  %v641_v31 = vmul.f32 1.442695, %v2313_v63 }
 0x219   : > { %596 = vmax.xlane.f32.xlu2 %v595_v7  ;;  %683 = vadd.xlane.f32.xlu0 %v682_v9 }
 0x21a   : > { %795 = vadd.xlane.f32.xlu1 %v794_v12 }
 0x21d   : > { %v573_v45 = vpop.xlane.xlu0 %572 }
 0x21e   : > { %v2323_v37 = vsub.f32 %v2169_v40, %v573_v45  ;;  %v661_v40 = vsel %vm552_vm1, %v2274_v58, 0.0 }
 0x220   : > { %v629_v0 = vmul.f32 1.442695, %v2323_v37 }
 0x221   : > { %762 = vadd.xlane.f32.xlu2 %v761_v15  ;;  %v594_v19 = vpop.xlane.xlu1 %593 }
 0x222   : > { %v2334_v10 = vsub.f32 %v2183_v49, %v594_v19 }
 0x225   : > { %v2300_v17 = vpop.xlane.xlu0 %599 }
 0x229   : > { %653 = vadd.xlane.f32.xlu2 %v652_v18  ;;  %v2309_v27 = vpop.xlane.xlu1 %575 }
 0x22d   : > { %v2306_v24 = vpop.xlane.xlu0 %765 }
 0x231   : > { %789 = vadd.xlane.f32.xlu2 %v788_v20  ;;  %v2316_v36 = vpop.xlane.xlu1 %650 }
 0x232   : > { %vm814_vm13 = vweird.f32 %v2316_v36 }
 0x239   : > { %771 = vadd.xlane.f32.xlu2 %v770_v28  ;;  %v675_v30 = vpop.xlane.xlu0 %674 }
 0x23a   : > { %1881 = vrcp.f32 %v675_v30  ;;  %v940_v47 = vand.u32 2147483648, %v675_v30  ;;  %v938_v52 = vand.u32 2147483647, %v675_v30  ;;  %vm934_vm3 = vweird.f32 %v675_v30 }
 0x23b   : > { %1883 = vlog2.f32 %v675_v30  ;;  %v787_v4 = vpop.xlane.xlu1 %786 }
 0x23c   : > { %v941_v7 = vor.u32 1.1754944e-38, %v940_v47  ;;  %vm939_vm5 = vcmp.eq.f32.partialorder %v938_v52, 8.507059e+37 }
 0x240   : > { %v1882_v29 = vpop.eup %1881 }
 0x241   : > { %v930_v41 = vmul.f32 %v1882_v29, %v675_v30  ;;  %680 = vadd.xlane.f32.xlu2 %v679_v39  ;;  %v657_v42 = vpop.xlane.xlu0 %656  ;;  %vm935_vm2 = vweird.f32 %v1882_v29  ;;  %v1884_v33 = vpop.eup %1883  ;;  %v643_v39 = vmul.f32 1.442695, %v2334_v10 }
 0x242   : > { %1885 = vrcp.f32 %v657_v42  ;;  %vm936_vm4 = vmor %vm934_vm3, %vm935_vm2  ;;  %v2336_v15 = vmul.f32 0.6931472, %v1884_v33  ;;  %v850_v58 = vand.u32 2147483648, %v657_v42  ;;  %vm844_vm9 = vweird.f32 %v657_v42 }
 0x243   : > { %1887 = vpow2.f32 %v641_v31  ;;  %v931_v26 = vsub.f32 1.0, %v930_v41  ;;  %v848_v31 = vand.u32 2147483647, %v657_v42 }
 0x244   : > { %1889 = vlog2.f32 %v657_v42  ;;  %v851_v47 = vor.u32 1.1754944e-38, %v850_v58 }
 0x245   : > { %v932_v51 = vmul.f32 %v1882_v29, %v931_v26  ;;  %1891 = vpow2.f32 %v629_v0  ;;  %vm849_vm11 = vcmp.eq.f32.partialorder %v848_v31, 8.507059e+37 }
 0x247   : > { %v933_v34 = vadd.f32 %v1882_v29, %v932_v51 }
 0x248   : > { %v1886_v38 = vpop.eup %1885 }
 0x249   : > { %v2330_v8 = vpop.eup %1887  ;;  %v937_v9 = vsel %vm936_vm4, %v1882_v29, %v933_v34  ;;  %v840_v12 = vmul.f32 %v1886_v38, %v657_v42  ;;  %662 = vadd.xlane.f32.xlu2 %v661_v40  ;;  %vm845_vm8 = vweird.f32 %v1886_v38  ;;  %v1639_v29 = vsel %vm1550_vm6, %v2214_v1, 0.0  ;;  %v769_v42 = vpop.xlane.xlu1 %768 }
 0x24a   : > { %v942_v45 = vsel %vm939_vm5, %v941_v7, %v937_v9  ;;  %v757_v28 = vmul.f32 %v2330_v8, %v2313_v63  ;;  %v1890_v26 = vpop.eup %1889  ;;  %vm846_vm10 = vmor %vm844_vm9, %vm845_vm8  ;;  %v2357_v1 = vsub.f32 %v2203_v59, %v2309_v27 }
 0x24b   : > { %v943_v18 = vmul.f32 %v942_v45, %v787_v4  ;;  %v841_v21 = vsub.f32 1.0, %v840_v12  ;;  %v570_v20 = vpop.xlane.xlu2 %569  ;;  %v1892_v52 = vpop.eup %1891  ;;  %v702_v34 = vmul.f32 0.6931472, %v1890_v26  ;;  %v1633_v12 = vsel %vm1550_vm6, %v2231_v13, 0.0 }
 0x24c   : > { %v2339_v5 = vsub.f32 %v2189_v53, %v570_v20  ;;  %v797_v51 = vsel %vm552_vm1, %v757_v28, 0.0  ;;  %v751_v7 = vmul.f32 %v1892_v52, %v2323_v37  ;;  %v2374_v13 = vsub.f32 %v2192_v54, %v2300_v17 }
 0x24d   : > { %v1057_v19 = vsub.f32 %v2336_v15, %v943_v18  ;;  %v842_v30 = vmul.f32 %v1886_v38, %v841_v21  ;;  %v667_v26 = vsel %vm552_vm1, %v1892_v52, 0.0 }
 0x24e   : > { %v627_v41 = vmul.f32 1.442695, %v2339_v5  ;;  %v779_v21 = vsel %vm552_vm1, %v751_v7, 0.0  ;;  %v647_v28 = vmul.f32 1.442695, %v2374_v13 }
 0x24f   : > { %v843_v53 = vadd.f32 %v1886_v38, %v842_v30  ;;  %v2352_v22 = vsel %vm1549_vm7, %v1057_v19, %v1639_v29  ;;  %v685_v29 = vsel %vm552_vm1, %v2330_v8, 0.0 }
 0x250   : > { %1893 = vpow2.f32 %v627_v41  ;;  %v2412_v7 = vpop.xlane.xlu0 %792 }
 0x251   : > { %v847_v33 = vsel %vm846_vm10, %v1886_v38, %v843_v53  ;;  %798 = vadd.xlane.f32.xlu2 %v797_v51  ;;  %1895 = vpow2.f32 %v643_v39  ;;  %v631_v38 = vmul.f32 1.442695, %v2357_v1  ;;  %v2399_v51 = vsub.f32 %v2222_v6, %v2336_v15 }
 0x252   : > { %v852_v0 = vsel %vm849_vm11, %v851_v47, %v847_v33  ;;  %v1073_v33 = vld [vmem:[%s2395_s27 + $0x40] sm:$0xff] }
 0x253   : > { %v853_v4 = vmul.f32 %v852_v0, %v769_v42  ;;  %1897 = vpow2.f32 %v631_v38  ;;  %v2403_v52 = vadd.f32 %v1073_v33, %v2399_v51  ;;  %v2409_v0 = vsub.f32 %v2228_v11, %v702_v34  ;;  %v2422_v38 = vpop.permute.xlu2 %1588 }
 0x254   : > { %1899 = vpow2.f32 %v647_v28 }
 0x255   : > { %v1051_v40 = vsub.f32 %v702_v34, %v853_v4  ;;  %1901 = vrcp.f32 %v2316_v36  ;;  %v1121_v42 = vsel %vm552_vm1, %v2403_v52, -inf  ;;  %v1067_v4 = vld [vmem:[%s2395_s27 + $0x10] sm:$0xff] }
 0x256   : > { %v1894_v9 = vpop.eup %1893  ;;  %v2415_v6 = vadd.f32 %v1067_v4, %v2409_v0 }
 0x257   : > { %v664_v45 = vsel %vm552_vm1, %v1894_v9, 0.0  ;;  %v750_v18 = vmul.f32 %v1894_v9, %v2339_v5  ;;  %v2368_v59 = vsel %vm1549_vm7, %v1051_v40, %v1633_v12  ;;  %v1896_v27 = vpop.eup %1895  ;;  %v2420_v12 = vpop.xlane.xlu1 %677 }
 0x258   : > { %3330 = vst [vmem:[#allocation4_spill] sm:$0xff] %v2368_v59  ;;  %665 = vadd.xlane.f32.xlu0 %v664_v45  ;;  %v758_v58 = vmul.f32 %v1896_v27, %v2334_v10  ;;  %v688_v31 = vsel %vm552_vm1, %v1896_v27, 0.0  ;;  %v1103_v40 = vsel %vm552_vm1, %v2415_v6, -inf  ;;  %1903 = vrcp.f32 %v2420_v12 }
 0x259   : > { %780 = vadd.xlane.f32.xlu2 %v779_v21  ;;  %v776_v20 = vsel %vm552_vm1, %v750_v18, 0.0  ;;  %v1898_v30 = vpop.eup %1897  ;;  %1905 = vlog2.f32 %v2316_v36  ;;  %vm949_vm8 = vweird.f32 %v2420_v12 }
 0x25a   : > { %777 = vadd.xlane.f32.xlu1 %v776_v20  ;;  %v800_v19 = vsel %vm552_vm1, %v758_v58, 0.0  ;;  %v752_v17 = vmul.f32 %v1898_v30, %v2357_v1  ;;  %v670_v41 = vsel %vm552_vm1, %v1898_v30, 0.0  ;;  %v2385_v53 = vpop.eup %1899 }
 0x25b   : > { %v760_v47 = vmul.f32 %v2385_v53, %v2374_v13  ;;  %v1902_v15 = vpop.eup %1901 }
 0x25c   : > { %v782_v39 = vsel %vm552_vm1, %v752_v17, 0.0  ;;  %v810_v9 = vmul.f32 %v1902_v15, %v2316_v36  ;;  %vm815_vm12 = vweird.f32 %v1902_v15  ;;  %v818_v17 = vand.u32 2147483647, %v2316_v36 }
 0x25d   : > { %v806_v8 = vsel %vm552_vm1, %v760_v47, 0.0  ;;  %vm816_vm14 = vmor %vm814_vm13, %vm815_vm12 }
 0x25e   : > { %v811_v34 = vsub.f32 1.0, %v810_v9  ;;  %v2428_v18 = vpop.eup %1903  ;;  %vm819_vm15 = vcmp.eq.f32.partialorder %v818_v17, 8.507059e+37 }
 0x25f   : > { %v2432_v20 = vpop.xlane.xlu1 %659  ;;  %v1906_v30 = vpop.eup %1905  ;;  %vm950_vm4 = vweird.f32 %v2428_v18 }
 0x260   : > { %801 = vadd.xlane.f32.xlu0 %v800_v19  ;;  %v812_v45 = vmul.f32 %v1902_v15, %v811_v34  ;;  %v820_v19 = vand.u32 2147483648, %v2316_v36  ;;  %vm2511_vm9 = vmor %vm949_vm8, %vm950_vm4  ;;  %vm859_vm12 = vweird.f32 %v2432_v20 }
 0x261   : > { %689 = vadd.xlane.f32.xlu2 %v688_v31  ;;  %v945_v31 = vmul.f32 %v2428_v18, %v2420_v12 }
 0x262   : > { %686 = vadd.xlane.f32.xlu1 %v685_v29  ;;  %v813_v28 = vadd.f32 %v1902_v15, %v812_v45 }
 0x268   : > { %783 = vadd.xlane.f32.xlu0 %v782_v39  ;;  %v817_v39 = vsel %vm816_vm14, %v1902_v15, %v813_v28  ;;  %v1631_v15 = vsel %vm1550_vm6, %v2196_v56, 0.0 }
 0x269   : > { %671 = vadd.xlane.f32.xlu2 %v670_v41  ;;  %v698_v41 = vmul.f32 0.6931472, %v1906_v30 }
 0x26a   : > { %668 = vadd.xlane.f32.xlu1 %v667_v26  ;;  %v821_v26 = vor.u32 1.1754944e-38, %v820_v19 }
 0x26b   : > { %v2457_v28 = vsub.f32 %v2199_v57, %v698_v41 }
 0x271   : > { %807 = vadd.xlane.f32.xlu2 %v806_v8  ;;  %v946_v8 = vsub.f32 1.0, %v945_v31 }
 0x273   : > { %v947_v17 = vmul.f32 %v2428_v18, %v946_v8 }
 0x279   : > { %1122 = vmax.xlane.f32.xlu2 %v1121_v42 }
 0x281   : > { %1104 = vmax.xlane.f32.xlu2 %v1103_v40  ;;  %v822_v40 = vsel %vm819_vm15, %v821_v26, %v817_v39 }
 0x284   : > { %v2424_v11 = vpop.xlane.xlu0 %774 }
 0x28c   : > { %v597_v27 = vpop.xlane.xlu2 %596  ;;  %v2430_v21 = vpop.xlane.xlu0 %683 }
 0x28d   : > { %v2435_v58 = vsub.f32 %v2286_v3, %v597_v27  ;;  %1907 = vrcp.f32 %v2430_v21  ;;  %v1076_v27 = vld [vmem:[%s2395_s27 + $0x58] sm:$0xff]  ;;  %v985_v30 = vand.u32 2147483648, %v2430_v21  ;;  %vm979_vm2 = vweird.f32 %v2430_v21 }
 0x28e   : > { %1909 = vlog2.f32 %v2430_v21 }
 0x28f   : > { %v645_v29 = vmul.f32 1.442695, %v2435_v58  ;;  %1911 = vrcp.f32 %v2432_v20 }
 0x291   : > { %1913 = vpow2.f32 %v645_v29 }
 0x292   : > { %1915 = vlog2.f32 %v2420_v12 }
 0x293   : > { %v1908_v47 = vpop.eup %1907  ;;  %1917 = vlog2.f32 %v2432_v20 }
 0x294   : > { %v1910_v33 = vpop.eup %1909  ;;  %v975_v42 = vmul.f32 %v1908_v47, %v2430_v21  ;;  %v763_v4 = vpop.xlane.xlu2 %762  ;;  %vm980_vm0 = vweird.f32 %v1908_v47 }
 0x295   : > { %v823_v9 = vmul.f32 %v822_v40, %v763_v4  ;;  %v2448_v36 = vmul.f32 0.6931472, %v1910_v33  ;;  %v2450_v34 = vpop.eup %1911  ;;  %vm2480_vm3 = vmor %vm979_vm2, %vm980_vm0 }
 0x296   : > { %v976_v45 = vsub.f32 1.0, %v975_v42  ;;  %v855_v57 = vmul.f32 %v2450_v34, %v2432_v20  ;;  %v983_v42 = vand.u32 2147483647, %v2430_v21  ;;  %vm860_vm11 = vweird.f32 %v2450_v34 }
 0x297   : > { %v1914_v19 = vpop.eup %1913  ;;  %v1049_v31 = vsub.f32 %v698_v41, %v823_v9  ;;  %v2462_v29 = vsub.f32 %v2272_v55, %v2448_v36  ;;  %v1065_v55 = vld [vmem:[%s2395_s27] sm:$0xff]  ;;  %vm2554_vm14 = vmor %vm859_vm12, %vm860_vm11 }
 0x298   : > { %v1916_v39 = vpop.eup %1915  ;;  %v977_v26 = vmul.f32 %v1908_v47, %v976_v45  ;;  %v691_v56 = vsel %vm552_vm1, %v1914_v19, 0.0  ;;  %v759_v33 = vmul.f32 %v1914_v19, %v2435_v58  ;;  %v986_v19 = vor.u32 1.1754944e-38, %v985_v30 }
 0x299   : > { %692 = vadd.xlane.f32.xlu0 %v691_v56  ;;  %v2471_v41 = vadd.f32 %v1076_v27, %v2462_v29  ;;  %v2476_v8 = vsel %vm1549_vm7, %v1049_v31, %v1631_v15  ;;  %v2486_v27 = vmul.f32 0.6931472, %v1916_v39  ;;  %v2492_v21 = vadd.f32 %v1065_v55, %v2457_v28  ;;  %v796_v56 = vpop.xlane.xlu1 %795 }
 0x29a   : > { %v978_v4 = vadd.f32 %v1908_v47, %v977_v26  ;;  %v803_v40 = vsel %vm552_vm1, %v759_v33, 0.0  ;;  %vm984_vm5 = vcmp.eq.f32.partialorder %v983_v42, 8.507059e+37  ;;  %v948_v39 = vadd.f32 %v2428_v18, %v947_v17 }
 0x29b   : > { %804 = vadd.xlane.f32.xlu1 %v803_v40  ;;  %v1130_v45 = vsel %vm552_vm1, %v2471_v41, -inf  ;;  %v856_v26 = vsub.f32 1.0, %v855_v57  ;;  %v955_v30 = vand.u32 2147483648, %v2420_v12  ;;  %v953_v55 = vand.u32 2147483647, %v2420_v12  ;;  %v1074_v57 = vld [vmem:[%s2395_s27 + $0x48] sm:$0xff] }
 0x29c   : > { %1131 = vmax.xlane.f32.xlu2 %v1130_v45  ;;  %v2489_v15 = vpop.xlane.xlu2 %653  ;;  %v982_v31 = vsel %vm2480_vm3, %v1908_v47, %v978_v4  ;;  %v2505_v40 = vsub.f32 %v2248_v32, %v2486_v27  ;;  %v1097_v42 = vsel %vm552_vm1, %v2492_v21, -inf  ;;  %v1918_v4 = vpop.eup %1917  ;;  %v952_v12 = vsel %vm2511_vm9, %v2428_v18, %v948_v39 }
 0x29d   : > { %1919 = vrcp.f32 %v2489_v15  ;;  %v987_v33 = vsel %vm984_vm5, %v986_v19, %v982_v31  ;;  %v857_v32 = vmul.f32 %v2450_v34, %v856_v26  ;;  %v1642_v45 = vsel %vm1550_vm6, %v2293_v14, 0.0 }
 0x29e   : > { %1921 = vlog2.f32 %v2489_v15  ;;  %v988_v47 = vmul.f32 %v987_v33, %v796_v56  ;;  %v694_v19 = vsel %vm552_vm1, %v2385_v53, 0.0  ;;  %v956_v31 = vor.u32 1.1754944e-38, %v955_v30 }
 0x29f   : > { %vm954_vm10 = vcmp.eq.f32.partialorder %v953_v55, 8.507059e+37  ;;  %v2527_v33 = vadd.f32 %v1074_v57, %v2505_v40  ;;  %v1640_v14 = vsel %vm1550_vm6, %v2238_v23, 0.0  ;;  %v704_v30 = vmul.f32 0.6931472, %v1918_v4  ;;  %v1066_v57 = vld [vmem:[%s2395_s27 + $0x8] sm:$0xff] }
 0x2a0   : > { %v1060_v9 = vsub.f32 %v2448_v36, %v988_v47  ;;  %v957_v26 = vsel %vm954_vm10, %v956_v31, %v952_v12  ;;  %v858_v55 = vadd.f32 %v2450_v34, %v857_v32  ;;  %v865_v23 = vand.u32 2147483648, %v2432_v20 }
 0x2a1   : > { %1098 = vmax.xlane.f32.xlu0 %v1097_v42  ;;  %v1124_v12 = vsel %vm552_vm1, %v2527_v33, -inf  ;;  %v833_v31 = vand.u32 2147483647, %v2489_v15  ;;  %vm829_vm15 = vweird.f32 %v2489_v15 }
 0x2a2   : > { %v2531_v18 = vsel %vm1549_vm7, %v1060_v9, %v1642_v45  ;;  %v863_v9 = vand.u32 2147483647, %v2432_v20  ;;  %v835_v45 = vand.u32 2147483648, %v2489_v15  ;;  %v2559_v20 = vsub.f32 %v2253_v35, %v704_v30 }
 0x2a3   : > { %v1920_v56 = vpop.eup %1919  ;;  %695 = vadd.xlane.f32.xlu1 %v694_v19  ;;  %3335 = vst [vmem:[#allocation5_spill] sm:$0xff] %v2531_v18  ;;  %vm834_vm3 = vcmp.eq.f32.partialorder %v833_v31, 8.507059e+37  ;;  %v1641_v18 = vsel %vm1550_vm6, %v2265_v46, 0.0 }
 0x2a4   : > { %v1922_v36 = vpop.eup %1921  ;;  %v825_v39 = vmul.f32 %v1920_v56, %v2489_v15  ;;  %v790_v53 = vpop.xlane.xlu2 %789  ;;  %vm830_vm13 = vweird.f32 %v1920_v56  ;;  %v836_v35 = vor.u32 1.1754944e-38, %v835_v45  ;;  %vm864_vm2 = vcmp.eq.f32.partialorder %v863_v9, 8.507059e+37 }
 0x2a5   : > { %v958_v47 = vmul.f32 %v957_v26, %v790_v53  ;;  %v2537_v42 = vmul.f32 0.6931472, %v1922_v36  ;;  %vm831_vm0 = vmor %vm829_vm15, %vm830_vm13 }
 0x2a6   : > { %v826_v17 = vsub.f32 1.0, %v825_v39  ;;  %v1068_v39 = vld [vmem:[%s2395_s27 + $0x18] sm:$0xff] }
 0x2a7   : > { %3336 = vst [vmem:[#allocation6_spill] sm:$0xff] %v2537_v42  ;;  %v1058_v4 = vsub.f32 %v2486_v27, %v958_v47  ;;  %v2551_v32 = vsub.f32 %v2180_v48, %v2537_v42  ;;  %v862_v48 = vsel %vm2554_vm14, %v2450_v34, %v858_v55  ;;  %v866_v47 = vor.u32 1.1754944e-38, %v865_v23 }
 0x2a8   : > { %v827_v19 = vmul.f32 %v1920_v56, %v826_v17  ;;  %v2576_v34 = vadd.f32 %v1068_v39, %v2559_v20  ;;  %v1634_v23 = vsel %vm1550_vm6, %v2262_v44, 0.0 }
 0x2a9   : > { %1125 = vmax.xlane.f32.xlu0 %v1124_v12  ;;  %v2562_v27 = vadd.f32 %v1066_v57, %v2551_v32  ;;  %v2570_v53 = vsel %vm1549_vm7, %v1058_v4, %v1640_v14  ;;  %v867_v12 = vsel %vm864_vm2, %v866_v47, %v862_v48  ;;  %v1075_v47 = vld [vmem:[%s2395_s27 + $0x50] sm:$0xff] }
 0x2aa   : > { %v828_v26 = vadd.f32 %v1920_v56, %v827_v19  ;;  %v1106_v9 = vsel %vm552_vm1, %v2576_v34, -inf }
 0x2ab   : > { %v1100_v17 = vsel %vm552_vm1, %v2562_v27, -inf }
 0x2ac   : > { %1101 = vmax.xlane.f32.xlu1 %v1100_v17  ;;  %v772_v57 = vpop.xlane.xlu2 %771  ;;  %v832_v55 = vsel %vm831_vm0, %v1920_v56, %v828_v26 }
 0x2ad   : > { %v868_v14 = vmul.f32 %v867_v12, %v772_v57  ;;  %v837_v4 = vsel %vm834_vm3, %v836_v35, %v832_v55 }
 0x2ae   : > { %v2579_v19 = vmul.f32 %v837_v4, %v2306_v24 }
 0x2af   : > { %v1052_v15 = vsub.f32 %v704_v30, %v868_v14 }
 0x2b0   : > { %3339 = vst [vmem:[#allocation7_spill] sm:$0xff] %v2579_v19 }
 0x2b1   : > { %1107 = vmax.xlane.f32.xlu0 %v1106_v9  ;;  %v2590_v56 = vsel %vm1549_vm7, %v1052_v15, %v1634_v23 }
 0x2b2   : > { %3340 = vst [vmem:[#allocation8_spill] sm:$0xff] %v2590_v56 }
 0x2b4   : > { %v681_v31 = vpop.xlane.xlu2 %680 }
 0x2b5   : > { %1923 = vrcp.f32 %v681_v31  ;;  %v970_v26 = vand.u32 2147483648, %v681_v31  ;;  %v968_v17 = vand.u32 2147483647, %v681_v31  ;;  %vm964_vm5 = vweird.f32 %v681_v31 }
 0x2b6   : > { %1925 = vlog2.f32 %v681_v31 }
 0x2b7   : > { %v971_v4 = vor.u32 1.1754944e-38, %v970_v26  ;;  %vm969_vm9 = vcmp.eq.f32.partialorder %v968_v17, 8.507059e+37 }
 0x2bb   : > { %v1924_v24 = vpop.eup %1923 }
 0x2bc   : > { %v1926_v30 = vpop.eup %1925  ;;  %v960_v36 = vmul.f32 %v1924_v24, %v681_v31  ;;  %v663_v48 = vpop.xlane.xlu2 %662  ;;  %vm965_vm4 = vweird.f32 %v1924_v24  ;;  %v1069_v31 = vld [vmem:[%s2395_s27 + $0x20] sm:$0xff] }
 0x2bd   : > { %1927 = vrcp.f32 %v663_v48  ;;  %v718_v39 = vmul.f32 0.6931472, %v1926_v30  ;;  %vm966_vm8 = vmor %vm964_vm5, %vm965_vm4  ;;  %v880_v54 = vand.u32 2147483648, %v663_v48  ;;  %v878_v49 = vand.u32 2147483647, %v663_v48 }
 0x2be   : > { %v961_v44 = vsub.f32 1.0, %v960_v36  ;;  %1929 = vlog2.f32 %v663_v48  ;;  %vm874_vm11 = vweird.f32 %v663_v48 }
 0x2bf   : > { %v2594_v57 = vsub.f32 %v2241_v25, %v718_v39  ;;  %vm879_vm13 = vcmp.eq.f32.partialorder %v878_v49, 8.507059e+37 }
 0x2c0   : > { %v962_v35 = vmul.f32 %v1924_v24, %v961_v44 }
 0x2c1   : > { %v2597_v55 = vadd.f32 %v1075_v47, %v2594_v57 }
 0x2c2   : > { %v963_v12 = vadd.f32 %v1924_v24, %v962_v35 }
 0x2c3   : > { %v1928_v14 = vpop.eup %1927  ;;  %v1127_v9 = vsel %vm552_vm1, %v2597_v55, -inf }
 0x2c4   : > { %v1930_v15 = vpop.eup %1929  ;;  %v870_v23 = vmul.f32 %v1928_v14, %v663_v48  ;;  %v2601_v30 = vpop.xlane.xlu2 %798  ;;  %v967_v36 = vsel %vm966_vm8, %v1924_v24, %v963_v12  ;;  %1128 = vmax.xlane.f32.xlu1 %v1127_v9  ;;  %vm875_vm10 = vweird.f32 %v1928_v14 }
 0x2c5   : > { %v706_v25 = vmul.f32 0.6931472, %v1930_v15  ;;  %v972_v44 = vsel %vm969_vm9, %v971_v4, %v967_v36  ;;  %vm876_vm12 = vmor %vm874_vm11, %vm875_vm10 }
 0x2c6   : > { %v871_v35 = vsub.f32 1.0, %v870_v23  ;;  %v973_v47 = vmul.f32 %v972_v44, %v2412_v7  ;;  %v1635_v44 = vsel %vm1550_vm6, %v2281_v2, 0.0 }
 0x2c7   : > { %v2606_v45 = vsub.f32 %v2268_v50, %v706_v25 }
 0x2c8   : > { %v872_v26 = vmul.f32 %v1928_v14, %v871_v35  ;;  %v1059_v17 = vsub.f32 %v718_v39, %v973_v47  ;;  %v881_v39 = vor.u32 1.1754944e-38, %v880_v54 }
 0x2c9   : > { %v2612_v24 = vadd.f32 %v1069_v31, %v2606_v45 }
 0x2ca   : > { %v873_v12 = vadd.f32 %v1928_v14, %v872_v26  ;;  %v2616_v4 = vsel %vm1549_vm7, %v1059_v17, %v1641_v18 }
 0x2cb   : > { %3341 = vst [vmem:[#allocation9_spill] sm:$0xff] %v2616_v4  ;;  %v1109_v50 = vsel %vm552_vm1, %v2612_v24, -inf  ;;  %v666_v7 = vpop.xlane.xlu0 %665 }
 0x2cc   : > { %1931 = vrcp.f32 %v666_v7  ;;  %v2620_v15 = vpop.xlane.xlu2 %780  ;;  %1110 = vmax.xlane.f32.xlu1 %v1109_v50  ;;  %v877_v23 = vsel %vm876_vm12, %v1928_v14, %v873_v12  ;;  %v895_v17 = vand.u32 2147483648, %v666_v7  ;;  %v893_v12 = vand.u32 2147483647, %v666_v7 }
 0x2cd   : > { %v778_v46 = vpop.xlane.xlu1 %777  ;;  %1933 = vlog2.f32 %v666_v7  ;;  %v882_v9 = vsel %vm879_vm13, %v881_v39, %v877_v23  ;;  %vm889_vm15 = vweird.f32 %v666_v7 }
 0x2ce   : > { %v883_v18 = vmul.f32 %v882_v9, %v2424_v11  ;;  %v1070_v11 = vld [vmem:[%s2395_s27 + $0x28] sm:$0xff]  ;;  %v896_v23 = vor.u32 1.1754944e-38, %v895_v17  ;;  %vm894_vm2 = vcmp.eq.f32.partialorder %v893_v12, 8.507059e+37  ;;  %v1636_v17 = vsel %vm1550_vm6, %v2320_v43, 0.0 }
 0x2d0   : > { %v1053_v36 = vsub.f32 %v706_v25, %v883_v18  ;;  %v2644_v18 = vsel %vm1550_vm6, %v2276_v60, 0.0 }
 0x2d2   : > { %v1932_v48 = vpop.eup %1931  ;;  %v2628_v31 = vsel %vm1549_vm7, %v1053_v36, %v1635_v44 }
 0x2d3   : > { %v1934_v35 = vpop.eup %1933  ;;  %v885_v54 = vmul.f32 %v1932_v48, %v666_v7  ;;  %3342 = vst [vmem:[#allocation10_spill] sm:$0xff] %v2628_v31  ;;  %vm890_vm14 = vweird.f32 %v1932_v48 }
 0x2d4   : > { %v708_v49 = vmul.f32 0.6931472, %v1934_v35  ;;  %v690_v47 = vpop.xlane.xlu2 %689  ;;  %vm891_vm0 = vmor %vm889_vm15, %vm890_vm14 }
 0x2d5   : > { %v886_v26 = vsub.f32 1.0, %v885_v54  ;;  %1935 = vrcp.f32 %v690_v47  ;;  %v2630_v14 = vpop.xlane.xlu1 %686  ;;  %v1013_v54 = vand.u32 2147483647, %v690_v47  ;;  %vm1009_vm3 = vweird.f32 %v690_v47 }
 0x2d6   : > { %1937 = vrcp.f32 %v2630_v14  ;;  %v2635_v2 = vsub.f32 %v2339_v5, %v708_v49  ;;  %vm994_vm4 = vweird.f32 %v2630_v14  ;;  %v1000_v43 = vand.u32 2147483648, %v2630_v14 }
 0x2d7   : > { %v887_v25 = vmul.f32 %v1932_v48, %v886_v26  ;;  %1939 = vlog2.f32 %v690_v47  ;;  %v1015_v26 = vand.u32 2147483648, %v690_v47  ;;  %vm2661_vm8 = vcmp.eq.f32.partialorder %v1013_v54, 8.507059e+37 }
 0x2d8   : > { %v2638_v39 = vadd.f32 %v1070_v11, %v2635_v2  ;;  %1941 = vlog2.f32 %v2630_v14 }
 0x2d9   : > { %v888_v50 = vadd.f32 %v1932_v48, %v887_v25 }
 0x2da   : > { %v1112_v5 = vsel %vm552_vm1, %v2638_v39, -inf }
 0x2db   : > { %v1936_v9 = vpop.eup %1935  ;;  %v892_v36 = vsel %vm891_vm0, %v1932_v48, %v888_v50  ;;  %1113 = vmax.xlane.f32.xlu2 %v1112_v5 }
 0x2dc   : > { %v1938_v44 = vpop.eup %1937  ;;  %v897_v7 = vsel %vm894_vm2, %v896_v23, %v892_v36  ;;  %v1005_v35 = vmul.f32 %v1936_v9, %v690_v47  ;;  %v2648_v11 = vpop.xlane.xlu2 %671  ;;  %v998_v23 = vand.u32 2147483647, %v2630_v14  ;;  %vm1010_vm5 = vweird.f32 %v1936_v9 }
 0x2dd   : > { %v898_v25 = vmul.f32 %v897_v7, %v778_v46  ;;  %v990_v60 = vmul.f32 %v1938_v44, %v2630_v14  ;;  %1943 = vrcp.f32 %v2648_v11  ;;  %v2655_v48 = vpop.xlane.xlu1 %668  ;;  %v1940_v12 = vpop.eup %1939  ;;  %vm995_vm9 = vweird.f32 %v1938_v44  ;;  %vm1011_vm11 = vmor %vm1009_vm3, %vm1010_vm5 }
 0x2de   : > { %v1006_v50 = vsub.f32 1.0, %v1005_v35  ;;  %v1942_v36 = vpop.eup %1941  ;;  %1945 = vrcp.f32 %v2655_v48  ;;  %v1016_v35 = vor.u32 1.1754944e-38, %v1015_v26  ;;  %v2665_v56 = vmul.f32 0.6931472, %v1940_v12  ;;  %v802_v26 = vpop.xlane.xlu0 %801  ;;  %vm996_vm12 = vmor %vm994_vm4, %vm995_vm9 }
 0x2df   : > { %v1054_v5 = vsub.f32 %v708_v49, %v898_v25  ;;  %v991_v31 = vsub.f32 1.0, %v990_v60  ;;  %v722_v59 = vmul.f32 0.6931472, %v1942_v36  ;;  %vm2667_vm10 = vcmp.eq.f32.partialorder %v998_v23, 8.507059e+37  ;;  %v1078_v25 = vld [vmem:[%s2395_s27 + $0x68] sm:$0xff]  ;;  %v1077_v60 = vld [vmem:[%s2395_s27 + $0x60] sm:$0xff] }
 0x2e0   : > { %v1007_v46 = vmul.f32 %v1936_v9, %v1006_v50  ;;  %3345 = vst [vmem:[#allocation11_spill] sm:$0xff] %v2665_v56  ;;  %1947 = vlog2.f32 %v2648_v11  ;;  %v1001_v12 = vor.u32 1.1754944e-38, %v1000_v43  ;;  %v2682_v23 = vsub.f32 %v2334_v10, %v2665_v56 }
 0x2e1   : > { %v992_v4 = vmul.f32 %v1938_v44, %v991_v31  ;;  %v2676_v54 = vsel %vm1549_vm7, %v1054_v5, %v1636_v17  ;;  %v2685_v36 = vsub.f32 %v2313_v63, %v722_v59  ;;  %vm919_vm13 = vweird.f32 %v2648_v11 }
 0x2e2   : > { %v1008_v19 = vadd.f32 %v1936_v9, %v1007_v46  ;;  %3348 = vst [vmem:[#allocation12_spill] sm:$0xff] %v2676_v54  ;;  %1949 = vlog2.f32 %v2655_v48  ;;  %v2694_v5 = vadd.f32 %v1078_v25, %v2682_v23  ;;  %v925_v46 = vand.u32 2147483648, %v2648_v11 }
 0x2e3   : > { %v1944_v50 = vpop.eup %1943  ;;  %v993_v31 = vadd.f32 %v1938_v44, %v992_v4  ;;  %v2697_v10 = vadd.f32 %v1077_v60, %v2685_v36  ;;  %v923_v60 = vand.u32 2147483647, %v2648_v11  ;;  %v910_v49 = vand.u32 2147483648, %v2655_v48 }
 0x2e4   : > { %v915_v17 = vmul.f32 %v1944_v50, %v2648_v11  ;;  %v1012_v47 = vsel %vm1011_vm11, %v1936_v9, %v1008_v19  ;;  %v1946_v4 = vpop.eup %1945  ;;  %v1136_v19 = vsel %vm552_vm1, %v2694_v5, -inf  ;;  %vm920_vm14 = vweird.f32 %v1944_v50 }
 0x2e5   : > { %v997_v63 = vsel %vm996_vm12, %v1938_v44, %v993_v31  ;;  %v1017_v43 = vsel %vm2661_vm8, %v1016_v35, %v1012_v47  ;;  %v900_v54 = vmul.f32 %v1946_v4, %v2655_v48  ;;  %v1133_v9 = vsel %vm552_vm1, %v2697_v10, -inf  ;;  %1137 = vmax.xlane.f32.xlu1 %v1136_v19  ;;  %vm2721_vm0 = vmor %vm919_vm13, %vm920_vm14 }
 0x2e6   : > { %v916_v14 = vsub.f32 1.0, %v915_v17  ;;  %v1002_v42 = vsel %vm2667_vm10, %v1001_v12, %v997_v63  ;;  %v2710_v44 = vmul.f32 %v1017_v43, %v802_v26  ;;  %v1948_v7 = vpop.eup %1947  ;;  %1134 = vmax.xlane.f32.xlu0 %v1133_v9  ;;  %vm905_vm15 = vweird.f32 %v1946_v4  ;;  %v1072_v43 = vld [vmem:[%s2395_s27 + $0x38] sm:$0xff] }
 0x2e7   : > { %v1003_v25 = vmul.f32 %v1002_v42, %v2601_v30  ;;  %v901_v31 = vsub.f32 1.0, %v900_v54  ;;  %v712_v12 = vmul.f32 0.6931472, %v1948_v7  ;;  %v908_v63 = vand.u32 2147483647, %v2655_v48  ;;  %v1071_v7 = vld [vmem:[%s2395_s27 + $0x30] sm:$0xff] }
 0x2e8   : > { %3349 = vst [vmem:[#allocation13_spill] sm:$0xff] %v2710_v44  ;;  %v917_v35 = vmul.f32 %v1944_v50, %v916_v14  ;;  %v1950_v42 = vpop.eup %1949  ;;  %v926_v14 = vor.u32 1.1754944e-38, %v925_v46  ;;  %vm924_vm2 = vcmp.eq.f32.partialorder %v923_v60, 8.507059e+37  ;;  %vm904_vm3 = vweird.f32 %v2655_v48 }
 0x2e9   : > { %v1061_v17 = vsub.f32 %v722_v59, %v1003_v25  ;;  %v902_v26 = vmul.f32 %v1946_v4, %v901_v31  ;;  %v2726_v59 = vsub.f32 %v2357_v1, %v712_v12  ;;  %v710_v19 = vmul.f32 0.6931472, %v1950_v42  ;;  %vm906_vm4 = vmor %vm904_vm3, %vm905_vm15 }
 0x2ea   : > { %v918_v30 = vadd.f32 %v1944_v50, %v917_v35  ;;  %v784_v35 = vpop.xlane.xlu0 %783  ;;  %v911_v46 = vor.u32 1.1754944e-38, %v910_v49  ;;  %vm909_vm5 = vcmp.eq.f32.partialorder %v908_v63, 8.507059e+37 }
 0x2eb   : > { %v2731_v9 = vsel %vm1549_vm7, %v1061_v17, %v2644_v18  ;;  %v903_v25 = vadd.f32 %v1946_v4, %v902_v26  ;;  %v2738_v1 = vadd.f32 %v1072_v43, %v2726_v59  ;;  %v2741_v31 = vsub.f32 %v2323_v37, %v710_v19 }
 0x2ec   : > { %v922_v11 = vsel %vm2721_vm0, %v1944_v50, %v918_v30  ;;  %v1638_v37 = vsel %vm1550_vm6, %v2422_v38, 0.0  ;;  %v1637_v43 = vsel %vm1550_vm6, %v2298_v16, 0.0 }
 0x2ed   : > { %v927_v42 = vsel %vm924_vm2, %v926_v14, %v922_v11  ;;  %v907_v60 = vsel %vm906_vm4, %v1946_v4, %v903_v25  ;;  %v1118_v48 = vsel %vm552_vm1, %v2738_v1, -inf  ;;  %v2746_v17 = vadd.f32 %v1071_v7, %v2741_v31 }
 0x2ee   : > { %v928_v18 = vmul.f32 %v927_v42, %v784_v35  ;;  %v912_v50 = vsel %vm909_vm5, %v911_v46, %v907_v60  ;;  %1119 = vmax.xlane.f32.xlu1 %v1118_v48 }
 0x2ef   : > { %v913_v49 = vmul.f32 %v912_v50, %v2620_v15  ;;  %v1115_v26 = vsel %vm552_vm1, %v2746_v17, -inf  ;;  %v1079_v50 = vld [vmem:[%s2395_s27 + $0x70] sm:$0xff] }
 0x2f0   : > { %v1056_v30 = vsub.f32 %v712_v12, %v928_v18  ;;  %1116 = vmax.xlane.f32.xlu0 %v1115_v26  ;;  %v2765_v12 = vpop.xlane.xlu2 %807 }
 0x2f1   : > { %v1055_v63 = vsub.f32 %v710_v19, %v913_v49 }
 0x2f2   : > { %v2756_v4 = vsel %vm1549_vm7, %v1056_v30, %v1638_v37 }
 0x2f3   : > { %3352 = vst [vmem:[#allocation14_spill] sm:$0xff] %v2756_v4  ;;  %v2763_v15 = vsel %vm1549_vm7, %v1055_v63, %v1637_v43 }
 0x2f4   : > { %3353 = vst [vmem:[#allocation15_spill] sm:$0xff] %v2763_v15 }
 0x2f8   : > { %v1123_v54 = vpop.xlane.xlu2 %1122 }
 0x2f9   : > { %vm1155_vm9 = vcmp.eq.f32.partialorder %v2403_v52, %v1123_v54 }
 0x2fa   : > { %v1171_v37 = vsel %vm1155_vm9, %v2325_v61, 16 }
 0x300   : > { %v1105_v30 = vpop.xlane.xlu2 %1104 }
 0x301   : > { %vm1149_vm12 = vcmp.eq.f32.partialorder %v2415_v6, %v1105_v30 }
 0x302   : > { %v1165_v6 = vsel %vm1149_vm12, %v2325_v61, 16 }
 0x30c   : > { %v693_v38 = vpop.xlane.xlu0 %692 }
 0x30d   : > { %1951 = vrcp.f32 %v693_v38  ;;  %v1028_v18 = vand.u32 2147483647, %v693_v38  ;;  %v1030_v60 = vand.u32 2147483648, %v693_v38  ;;  %vm1024_vm11 = vweird.f32 %v693_v38 }
 0x30e   : > { %v805_v14 = vpop.xlane.xlu1 %804  ;;  %1953 = vlog2.f32 %v693_v38 }
 0x30f   : > { %v1031_v54 = vor.u32 1.1754944e-38, %v1030_v60  ;;  %vm1029_vm14 = vcmp.eq.f32.partialorder %v1028_v18, 8.507059e+37 }
 0x313   : > { %v1952_v25 = vpop.eup %1951 }
 0x314   : > { %v1954_v7 = vpop.eup %1953  ;;  %v1020_v11 = vmul.f32 %v1952_v25, %v693_v38  ;;  %v1099_v19 = vpop.xlane.xlu0 %1098  ;;  %vm1025_vm10 = vweird.f32 %v1952_v25 }
 0x315   : > { %v2767_v35 = vmul.f32 0.6931472, %v1954_v7  ;;  %vm1147_vm8 = vcmp.eq.f32.partialorder %v2492_v21, %v1099_v19  ;;  %vm1026_vm13 = vmor %vm1024_vm11, %vm1025_vm10 }
 0x316   : > { %v1021_v16 = vsub.f32 1.0, %v1020_v11  ;;  %v1163_v46 = vsel %vm1147_vm8, %v2325_v61, 16  ;;  %v2772_v42 = vpop.xlane.xlu1 %695 }
 0x317   : > { %3354 = vst [vmem:[#allocation16_spill] sm:$0xff] %v2767_v35  ;;  %v2775_v48 = vsel %vm552_vm1, %v1163_v46, 2147483647  ;;  %1955 = vrcp.f32 %v2772_v42  ;;  %v2781_v21 = vsub.f32 %v2435_v58, %v2767_v35  ;;  %v2793_v58 = vsel %vm552_vm1, %v1171_v37, 2147483647 }
 0x318   : > { %v1022_v49 = vmul.f32 %v1952_v25, %v1021_v16  ;;  %v1181_v52 = vshra.s32 %v2775_v48, 16  ;;  %1957 = vlog2.f32 %v2772_v42  ;;  %vm1039_vm3 = vweird.f32 %v2772_v42 }
 0x319   : > { %v2787_v63 = vadd.f32 %v1079_v50, %v2781_v21 }
 0x31a   : > { %v1023_v26 = vadd.f32 %v1952_v25, %v1022_v49  ;;  %v2789_v43 = vcvt.s32.f32 %v1181_v52  ;;  %v1301_v49 = vshra.s32 %v2793_v58, 16 }
 0x31b   : > { %v1139_v11 = vsel %vm552_vm1, %v2787_v63, -inf }
 0x31c   : > { %v1027_v7 = vsel %vm1026_vm13, %v1952_v25, %v1023_v26  ;;  %1184 = vmin.xlane.f32.xlu1 %v2789_v43  ;;  %v1126_v38 = vpop.xlane.xlu0 %1125  ;;  %1140 = vmax.xlane.f32.xlu2 %v1139_v11  ;;  %v1045_v26 = vand.u32 2147483648, %v2772_v42  ;;  %v1043_v11 = vand.u32 2147483647, %v2772_v42 }
 0x31d   : > { %v1956_v19 = vpop.eup %1955  ;;  %v1032_v16 = vsel %vm1029_vm14, %v1031_v54, %v1027_v7  ;;  %vm1156_vm15 = vcmp.eq.f32.partialorder %v2527_v33, %v1126_v38 }
 0x31e   : > { %v2800_v46 = vmul.f32 %v1032_v16, %v805_v14  ;;  %v1035_v60 = vmul.f32 %v1956_v19, %v2772_v42  ;;  %v1172_v25 = vsel %vm1156_vm15, %v2325_v61, 16  ;;  %v1958_v18 = vpop.eup %1957  ;;  %v2812_v14 = vsel %vm552_vm1, %v1165_v6, 2147483647  ;;  %v1080_v16 = vld [vmem:[%s2395_s27 + $0x78] sm:$0xff] }
 0x31f   : > { %v2805_v50 = vsel %vm552_vm1, %v1172_v25, 2147483647  ;;  %v1102_v30 = vpop.xlane.xlu1 %1101  ;;  %v2816_v54 = vmul.f32 0.6931472, %v1958_v18  ;;  %vm1040_vm2 = vweird.f32 %v1956_v19  ;;  %v1132_v25 = vpop.xlane.xlu2 %1131  ;;  %vm1044_vm9 = vcmp.eq.f32.partialorder %v1043_v11, 8.507059e+37 }
 0x320   : > { %3355 = vst [vmem:[#allocation17_spill] sm:$0xff] %v2800_v46  ;;  %v1036_v33 = vsub.f32 1.0, %v1035_v60  ;;  %v1316_v37 = vshra.s32 %v2805_v50, 16  ;;  %vm1148_vm0 = vcmp.eq.f32.partialorder %v2562_v27, %v1102_v30  ;;  %v2822_v60 = vcvt.s32.f32 %v1301_v49  ;;  %vm1041_vm4 = vmor %vm1039_vm3, %vm1040_vm2 }
 0x321   : > { %3356 = vst [vmem:[#allocation18_spill] sm:$0xff] %v2816_v54  ;;  %v2826_v6 = vsub.f32 %v2374_v13, %v2816_v54  ;;  %v1164_v27 = vsel %vm1148_vm0, %v2325_v61, 16  ;;  %v1046_v30 = vor.u32 1.1754944e-38, %v1045_v26  ;;  %v1211_v13 = vshra.s32 %v2812_v14, 16 }
 0x322   : > { %v1037_v7 = vmul.f32 %v1956_v19, %v1036_v33  ;;  %v2819_v38 = vcvt.s32.f32 %v1316_v37  ;;  %vm1158_vm8 = vcmp.eq.f32.partialorder %v2471_v41, %v1132_v25  ;;  %v2840_v37 = vsel %vm552_vm1, %v1164_v27, 2147483647 }
 0x323   : > { %v2834_v49 = vadd.f32 %v1080_v16, %v2826_v6  ;;  %v1174_v41 = vsel %vm1158_vm8, %v2325_v61, 16  ;;  %v2857_v25 = vcvt.s32.f32 %v1211_v13 }
 0x324   : > { %v1038_v47 = vadd.f32 %v1956_v19, %v1037_v7  ;;  %1319 = vmin.xlane.f32.xlu1 %v2819_v38  ;;  %v1108_v18 = vpop.xlane.xlu0 %1107  ;;  %1304 = vmin.xlane.f32.xlu2 %v2822_v60  ;;  %v2860_v27 = vsel %vm552_vm1, %v1174_v41, 2147483647 }
 0x325   : > { %vm1150_vm5 = vcmp.eq.f32.partialorder %v2576_v34, %v1108_v18  ;;  %v1142_v34 = vsel %vm552_vm1, %v2834_v49, -inf }
 0x326   : > { %v1166_v42 = vsel %vm1150_vm5, %v2325_v61, 16  ;;  %v1042_v33 = vsel %vm1041_vm4, %v1956_v19, %v1038_v47  ;;  %1143 = vmax.xlane.f32.xlu0 %v1142_v34  ;;  %v1196_v47 = vshra.s32 %v2840_v37, 16 }
 0x327   : > { %v2843_v26 = vsel %vm552_vm1, %v1166_v42, 2147483647  ;;  %v1047_v7 = vsel %vm1044_vm9, %v1046_v30, %v1042_v33  ;;  %v1346_v30 = vshra.s32 %v2860_v27, 16 }
 0x328   : > { %v1226_v16 = vshra.s32 %v2843_v26, 16  ;;  %v2849_v18 = vmul.f32 %v1047_v7, %v2765_v12  ;;  %v2864_v12 = vcvt.s32.f32 %v1196_v47 }
 0x329   : > { %v2868_v42 = vcvt.s32.f32 %v1346_v30 }
 0x32a   : > { %3357 = vst [vmem:[#allocation19_spill] sm:$0xff] %v2849_v18  ;;  %v2852_v11 = vcvt.s32.f32 %v1226_v16 }
 0x32c   : > { %1229 = vmin.xlane.f32.xlu1 %v2852_v11  ;;  %1214 = vmin.xlane.f32.xlu2 %v2857_v25 }
 0x32e   : > { %1199 = vmin.xlane.f32.xlu0 %v2864_v12 }
 0x334   : > { %1349 = vmin.xlane.f32.xlu2 %v2868_v42 }
 0x337   : > { %v1129_v33 = vpop.xlane.xlu1 %1128 }
 0x338   : > { %vm1157_vm10 = vcmp.eq.f32.partialorder %v2597_v55, %v1129_v33 }
 0x339   : > { %v1173_v13 = vsel %vm1157_vm10, %v2325_v61, 16 }
 0x33a   : > { %v2874_v34 = vsel %vm552_vm1, %v1173_v13, 2147483647 }
 0x33b   : > { %v1331_v7 = vshra.s32 %v2874_v34, 16 }
 0x33d   : > { %v2877_v16 = vcvt.s32.f32 %v1331_v7 }
 0x33f   : > { %1334 = vmin.xlane.f32.xlu0 %v2877_v16  ;;  %v1111_v41 = vpop.xlane.xlu1 %1110 }
 0x340   : > { %vm1151_vm11 = vcmp.eq.f32.partialorder %v2612_v24, %v1111_v41 }
 0x341   : > { %v1167_v47 = vsel %vm1151_vm11, %v2325_v61, 16 }
 0x342   : > { %v2883_v30 = vsel %vm552_vm1, %v1167_v47, 2147483647 }
 0x343   : > { %v1241_v55 = vshra.s32 %v2883_v30, 16 }
 0x345   : > { %v2886_v33 = vcvt.s32.f32 %v1241_v55 }
 0x347   : > { %1244 = vmin.xlane.f32.xlu0 %v2886_v33 }
 0x34e   : > { %v1114_v13 = vpop.xlane.xlu2 %1113 }
 0x34f   : > { %vm1152_vm12 = vcmp.eq.f32.partialorder %v2638_v39, %v1114_v13 }
 0x350   : > { %v1168_v7 = vsel %vm1152_vm12, %v2325_v61, 16 }
 0x351   : > { %v2892_v19 = vsel %vm552_vm1, %v1168_v7, 2147483647 }
 0x352   : > { %v1256_v24 = vshra.s32 %v2892_v19, 16 }
 0x354   : > { %v2895_v41 = vcvt.s32.f32 %v1256_v24 }
 0x356   : > { %1259 = vmin.xlane.f32.xlu2 %v2895_v41 }
 0x358   : > { %v1138_v47 = vpop.xlane.xlu1 %1137 }
 0x359   : > { %v1135_v52 = vpop.xlane.xlu0 %1134  ;;  %vm1160_vm13 = vcmp.eq.f32.partialorder %v2694_v5, %v1138_v47 }
 0x35a   : > { %vm1159_vm14 = vcmp.eq.f32.partialorder %v2697_v10, %v1135_v52  ;;  %v1176_v55 = vsel %vm1160_vm13, %v2325_v61, 16 }
 0x35b   : > { %v1175_v39 = vsel %vm1159_vm14, %v2325_v61, 16  ;;  %v2903_v13 = vsel %vm552_vm1, %v1176_v55, 2147483647 }
 0x35c   : > { %v2906_v7 = vsel %vm552_vm1, %v1175_v39, 2147483647  ;;  %v1376_v24 = vshra.s32 %v2903_v13, 16 }
 0x35d   : > { %v1361_v18 = vshra.s32 %v2906_v7, 16 }
 0x35e   : > { %v2910_v54 = vcvt.s32.f32 %v1376_v24 }
 0x35f   : > { %v2912_v44 = vcvt.s32.f32 %v1361_v18 }
 0x360   : > { %1379 = vmin.xlane.f32.xlu0 %v2910_v54 }
 0x361   : > { %v1120_v5 = vpop.xlane.xlu1 %1119  ;;  %1364 = vmin.xlane.f32.xlu1 %v2912_v44 }
 0x362   : > { %vm1154_vm15 = vcmp.eq.f32.partialorder %v2738_v1, %v1120_v5 }
 0x363   : > { %v1170_v10 = vsel %vm1154_vm15, %v2325_v61, 16  ;;  %v1117_v52 = vpop.xlane.xlu0 %1116 }
 0x364   : > { %v2919_v47 = vsel %vm552_vm1, %v1170_v10, 2147483647  ;;  %vm1153_vm0 = vcmp.eq.f32.partialorder %v2746_v17, %v1117_v52 }
 0x365   : > { %v1169_v55 = vsel %vm1153_vm0, %v2325_v61, 16  ;;  %v1286_v18 = vshra.s32 %v2919_v47, 16 }
 0x366   : > { %v2925_v39 = vsel %vm552_vm1, %v1169_v55, 2147483647  ;;  %v1300_v55 = vand.u32 65535, %v2793_v58  ;;  %v1210_v58 = vand.u32 65535, %v2812_v14 }
 0x367   : > { %v2927_v24 = vcvt.s32.f32 %v1286_v18  ;;  %v1271_v56 = vshra.s32 %v2925_v39, 16 }
 0x368   : > { %v1302_v35 = vcvt.s32.f32 %v1300_v55 }
 0x369   : > { %1289 = vmin.xlane.f32.xlu0 %v2927_v24  ;;  %v2931_v1 = vcvt.s32.f32 %v1271_v56 }
 0x36b   : > { %1274 = vmin.xlane.f32.xlu1 %v2931_v1 }
 0x38f   : > { %v1141_v5 = vpop.xlane.xlu2 %1140  ;;  %v2941_v18 = vpop.xlane.xlu1 %1184 }
 0x390   : > { %vm1161_vm2 = vcmp.eq.f32.partialorder %v2787_v63, %v1141_v5  ;;  %v1180_v63 = vand.u32 65535, %v2775_v48  ;;  %vm1186_vm5 = vcmp.eq.f32.partialorder %v2789_v43, %v2941_v18  ;;  %v1315_v43 = vand.u32 65535, %v2805_v50 }
 0x391   : > { %v1177_v17 = vsel %vm1161_vm2, %v2325_v61, 16 }
 0x392   : > { %v2937_v10 = vsel %vm552_vm1, %v1177_v17, 2147483647  ;;  %v1182_v15 = vcvt.s32.f32 %v1180_v63 }
 0x393   : > { %v1391_v52 = vshra.s32 %v2937_v10, 16 }
 0x395   : > { %v2943_v46 = vcvt.s32.f32 %v1391_v52 }
 0x397   : > { %1394 = vmin.xlane.f32.xlu2 %v2943_v46  ;;  %v2946_v56 = vpop.xlane.xlu2 %1304  ;;  %v2959_v4 = vpop.xlane.xlu1 %1319 }
 0x398   : > { %vm1306_vm3 = vcmp.eq.f32.partialorder %v2822_v60, %v2946_v56  ;;  %v1187_v60 = vsel %vm1186_vm5, %v1182_v15, inf  ;;  %vm1321_vm9 = vcmp.eq.f32.partialorder %v2819_v38, %v2959_v4  ;;  %v1195_v15 = vand.u32 65535, %v2840_v37 }
 0x399   : > { %v1307_v5 = vsel %vm1306_vm3, %v1302_v35, inf  ;;  %v1144_v17 = vpop.xlane.xlu0 %1143  ;;  %v1225_v38 = vand.u32 65535, %v2843_v26  ;;  %v1240_v26 = vand.u32 65535, %v2883_v30  ;;  %v1375_v30 = vand.u32 65535, %v2903_v13 }
 0x39a   : > { %1308 = vmin.xlane.f32.xlu0 %v1307_v5  ;;  %vm1162_vm4 = vcmp.eq.f32.partialorder %v2834_v49, %v1144_v17  ;;  %v1212_v49 = vcvt.s32.f32 %v1210_v58  ;;  %v1345_v17 = vand.u32 65535, %v2860_v27  ;;  %v1317_v58 = vcvt.s32.f32 %v1315_v43 }
 0x39b   : > { %v1178_v52 = vsel %vm1162_vm4, %v2325_v61, 16  ;;  %v1197_v50 = vcvt.s32.f32 %v1195_v15  ;;  %v1227_v27 = vcvt.s32.f32 %v1225_v38  ;;  %v1330_v43 = vand.u32 65535, %v2874_v34 }
 0x39c   : > { %v2957_v55 = vsel %vm552_vm1, %v1178_v52, 2147483647  ;;  %v1322_v52 = vsel %vm1321_vm9, %v1317_v58, inf  ;;  %v1242_v58 = vcvt.s32.f32 %v1240_v26  ;;  %v1255_v34 = vand.u32 65535, %v2892_v19 }
 0x39d   : > { %v1406_v35 = vshra.s32 %v2957_v55, 16  ;;  %v1332_v15 = vcvt.s32.f32 %v1330_v43  ;;  %v1285_v13 = vand.u32 65535, %v2919_v47  ;;  %v1390_v47 = vand.u32 65535, %v2937_v10 }
 0x39e   : > { %v1311_v26 = vcvt.f32.s32 %v2946_v56 }
 0x39f   : > { %v2962_v48 = vpop.xlane.xlu2 %1214  ;;  %1188 = vmin.xlane.f32.xlu2 %v1187_v60  ;;  %v2964_v5 = vcvt.s32.f32 %v1406_v35  ;;  %v1347_v60 = vcvt.s32.f32 %v1345_v17  ;;  %v2980_v35 = vpop.xlane.xlu1 %1229 }
 0x3a0   : > { %vm1216_vm8 = vcmp.eq.f32.partialorder %v2857_v25, %v2962_v48  ;;  %vm1231_vm12 = vcmp.eq.f32.partialorder %v2852_v11, %v2980_v35 }
 0x3a1   : > { %v1217_v14 = vsel %vm1216_vm8, %v1212_v49, inf  ;;  %1409 = vmin.xlane.f32.xlu1 %v2964_v5  ;;  %v2970_v63 = vpop.xlane.xlu0 %1199 }
 0x3a2   : > { %1218 = vmin.xlane.f32.xlu0 %v1217_v14  ;;  %vm1201_vm10 = vcmp.eq.f32.partialorder %v2864_v12, %v2970_v63  ;;  %v1232_v12 = vsel %vm1231_vm12, %v1227_v27, inf }
 0x3a3   : > { %v1202_v37 = vsel %vm1201_vm10, %v1197_v50, inf  ;;  %v1257_v50 = vcvt.s32.f32 %v1255_v34  ;;  %v1191_v34 = vcvt.f32.s32 %v2941_v18  ;;  %v1326_v18 = vcvt.f32.s32 %v2959_v4 }
 0x3a5   : > { %v1327_v4 = vshll.u32 %v1326_v18, 16 }
 0x3a7   : > { %v2978_v25 = vpop.xlane.xlu2 %1349  ;;  %1323 = vmin.xlane.f32.xlu2 %v1322_v52 }
 0x3a8   : > { %vm1351_vm11 = vcmp.eq.f32.partialorder %v2868_v42, %v2978_v25 }
 0x3a9   : > { %v1352_v49 = vsel %vm1351_vm11, %v1347_v60, inf  ;;  %1203 = vmin.xlane.f32.xlu1 %v1202_v37  ;;  %v1360_v60 = vand.u32 65535, %v2906_v7  ;;  %v1270_v7 = vand.u32 65535, %v2925_v39  ;;  %v1392_v39 = vcvt.s32.f32 %v1390_v47 }
 0x3aa   : > { %1353 = vmin.xlane.f32.xlu0 %v1352_v49 }
 0x3ab   : > { %v1362_v49 = vcvt.s32.f32 %v1360_v60  ;;  %v1221_v60 = vcvt.f32.s32 %v2962_v48  ;;  %v1968_v48 = vmov 0.0  }
 0x3af   : > { %1233 = vmin.xlane.f32.xlu2 %v1232_v12  ;;  %v1287_v12 = vcvt.s32.f32 %v1285_v13 }
 0x3b2   : > { %v2988_v14 = vpop.xlane.xlu0 %1334 }
 0x3b3   : > { %vm1336_vm13 = vcmp.eq.f32.partialorder %v2877_v16, %v2988_v14 }
 0x3b4   : > { %v1337_v42 = vsel %vm1336_vm13, %v1332_v15, inf  ;;  %v1272_v15 = vcvt.s32.f32 %v1270_v7 }
 0x3b5   : > { %1338 = vmin.xlane.f32.xlu1 %v1337_v42 }
 0x3ba   : > { %v2993_v17 = vpop.xlane.xlu0 %1244 }
 0x3bb   : > { %vm1246_vm14 = vcmp.eq.f32.partialorder %v2886_v33, %v2993_v17  ;;  %v1377_v33 = vcvt.s32.f32 %v1375_v30  ;;  %v1192_v30 = vshll.u32 %v1191_v34, 16 }
 0x3bc   : > { %v1247_v11 = vsel %vm1246_vm14, %v1242_v58, inf }
 0x3bd   : > { %1248 = vmin.xlane.f32.xlu1 %v1247_v11 }
 0x3c9   : > { %v2998_v52 = vpop.xlane.xlu2 %1259 }
 0x3ca   : > { %vm1261_vm15 = vcmp.eq.f32.partialorder %v2895_v41, %v2998_v52 }
 0x3cb   : > { %v1262_v16 = vsel %vm1261_vm15, %v1257_v50, inf  ;;  %v1312_v50 = vshll.u32 %v1311_v26, 16 }
 0x3cc   : > { %1263 = vmin.xlane.f32.xlu0 %v1262_v16  ;;  %v1405_v16 = vand.u32 65535, %v2957_v55  ;;  %v1222_v55 = vshll.u32 %v1221_v60, 16 }
 0x3d3   : > { %v3004_v38 = vpop.xlane.xlu0 %1379 }
 0x3d4   : > { %v3006_v37 = vpop.xlane.xlu1 %1364  ;;  %vm1381_vm0 = vcmp.eq.f32.partialorder %v2910_v54, %v3004_v38 }
 0x3d5   : > { %vm1366_vm2 = vcmp.eq.f32.partialorder %v2912_v44, %v3006_v37  ;;  %v1382_v19 = vsel %vm1381_vm0, %v1377_v33, inf }
 0x3d6   : > { %v1367_v41 = vsel %vm1366_vm2, %v1362_v49, inf  ;;  %1383 = vmin.xlane.f32.xlu1 %v1382_v19  ;;  %v1407_v19 = vcvt.s32.f32 %v1405_v16 }
 0x3d7   : > { %1368 = vmin.xlane.f32.xlu2 %v1367_v41 }
 0x3dc   : > { %v3014_v27 = vpop.xlane.xlu0 %1289 }
 0x3dd   : > { %vm1291_vm3 = vcmp.eq.f32.partialorder %v2927_v24, %v3014_v27 }
 0x3de   : > { %v3018_v43 = vpop.xlane.xlu1 %1274  ;;  %v1292_v54 = vsel %vm1291_vm3, %v1287_v12, inf }
 0x3df   : > { %1293 = vmin.xlane.f32.xlu1 %v1292_v54  ;;  %vm1276_vm4 = vcmp.eq.f32.partialorder %v2931_v1, %v3018_v43 }
 0x3e0   : > { %v1277_v44 = vsel %vm1276_vm4, %v1272_v15, inf }
 0x3e1   : > { %1278 = vmin.xlane.f32.xlu2 %v1277_v44  ;;  %v1206_v44 = vcvt.f32.s32 %v2970_v63 }
 0x40a   : > { %v3023_v42 = vpop.xlane.xlu2 %1394 }
 0x40b   : > { %vm1396_vm5 = vcmp.eq.f32.partialorder %v2943_v46, %v3023_v42 }
 0x40c   : > { %v1397_v24 = vsel %vm1396_vm5, %v1392_v39, inf }
 0x40d   : > { %1398 = vmin.xlane.f32.xlu0 %v1397_v24  ;;  %v1309_v58 = vpop.xlane.xlu0 %1308 }
 0x40e   : > { %v1310_v11 = vcvt.f32.s32 %v1309_v58 }
 0x410   : > { %v3029_v1 = vadd.s32 %v1312_v50, %v1310_v11  ;;  %v1207_v50 = vshll.u32 %v1206_v44, 16 }
 0x412   : > { %v1189_v10 = vpop.xlane.xlu2 %1188  ;;  %vm1427_vm8 = vcmp.eq.s32.totalorder %v2325_v61, %v3029_v1 }
 0x413   : > { %v1190_v33 = vcvt.f32.s32 %v1189_v10  ;;  %v1830_v12 = vsel %vm1427_vm8, 1.0, %v1968_v48 }
 0x414   : > { %v3035_v49 = vpop.xlane.xlu1 %1409  ;;  %v1475_v24 = vmul.f32 %v1830_v12, %v2399_v51  ;;  %v1341_v12 = vcvt.f32.s32 %v2988_v14 }
 0x415   : > { %v3033_v56 = vadd.s32 %v1192_v30, %v1190_v33  ;;  %v1219_v46 = vpop.xlane.xlu0 %1218  ;;  %vm1411_vm9 = vcmp.eq.f32.partialorder %v2964_v5, %v3035_v49  ;;  %v1356_v5 = vcvt.f32.s32 %v2978_v25 }
 0x416   : > { %v1220_v41 = vcvt.f32.s32 %v1219_v46  ;;  %v1412_v13 = vsel %vm1411_vm9, %v1407_v19, inf  ;;  %v1507_v25 = vsel %vm552_vm1, %v1475_v24, 0.0  ;;  %v1342_v14 = vshll.u32 %v1341_v12, 16 }
 0x417   : > { %vm1419_vm10 = vcmp.eq.s32.totalorder %v2325_v61, %v3033_v56  ;;  %1413 = vmin.xlane.f32.xlu2 %v1412_v13  ;;  %v1357_v10 = vshll.u32 %v1356_v5, 16 }
 0x418   : > { %v1822_v7 = vsel %vm1419_vm10, 1.0, %v1968_v48  ;;  %v3046_v54 = vadd.s32 %v1222_v55, %v1220_v41 }
 0x419   : > { %v1467_v15 = vmul.f32 %v1822_v7, %v2457_v28  ;;  %v1236_v28 = vcvt.f32.s32 %v2980_v35 }
 0x41a   : > { %v1324_v47 = vpop.xlane.xlu2 %1323  ;;  %vm1421_vm11 = vcmp.eq.s32.totalorder %v2325_v61, %v3046_v54 }
 0x41b   : > { %v1325_v39 = vcvt.f32.s32 %v1324_v47  ;;  %v1483_v26 = vsel %vm552_vm1, %v1467_v15, 0.0  ;;  %v1824_v60 = vsel %vm1421_vm11, 1.0, %v1968_v48  ;;  %v1237_v46 = vshll.u32 %v1236_v28, 16 }
 0x41c   : > { %1484 = vadd.xlane.f32.xlu0 %v1483_v26  ;;  %v1204_v11 = vpop.xlane.xlu1 %1203  ;;  %v1469_v13 = vmul.f32 %v1824_v60, %v2409_v0  ;;  %vm1548_vm11 = vcmp.eq.s32.totalorder %v2325_v61, 1 }
 0x41d   : > { %v3053_v58 = vadd.s32 %v1327_v4, %v1325_v39  ;;  %v1354_v34 = vpop.xlane.xlu0 %1353  ;;  %v1205_v63 = vcvt.f32.s32 %v1204_v11  ;;  %v1251_v11 = vcvt.f32.s32 %v2993_v17 }
 0x41e   : > { %v1355_v16 = vcvt.f32.s32 %v1354_v34  ;;  %v1489_v4 = vsel %vm552_vm1, %v1469_v13, 0.0 }
 0x41f   : > { %vm1428_vm12 = vcmp.eq.s32.totalorder %v2325_v61, %v3053_v58  ;;  %v3061_v51 = vadd.s32 %v1207_v50, %v1205_v63  ;;  %1508 = vadd.xlane.f32.xlu2 %v1507_v25  ;;  %v1252_v63 = vshll.u32 %v1251_v11, 16 }
 0x420   : > { %v1831_v30 = vsel %vm1428_vm12, 1.0, %v1968_v48  ;;  %v3065_v33 = vadd.s32 %v1357_v10, %v1355_v16  ;;  %vm1531_vm12 = vcmp.eq.s32.totalorder %v2325_v61, 0 }
 0x421   : > { %v1476_v35 = vmul.f32 %v1831_v30, %v2505_v40  ;;  %vm1420_vm13 = vcmp.eq.s32.totalorder %v2325_v61, %v3061_v51 }
 0x422   : > { %v1234_v19 = vpop.xlane.xlu2 %1233  ;;  %v1823_v55 = vsel %vm1420_vm13, 1.0, %v1968_v48  ;;  %vm1430_vm14 = vcmp.eq.s32.totalorder %v2325_v61, %v3065_v33 }
 0x423   : > { %v1235_v18 = vcvt.f32.s32 %v1234_v19  ;;  %v1510_v41 = vsel %vm552_vm1, %v1476_v35, 0.0  ;;  %v1468_v7 = vmul.f32 %v1823_v55, %v2551_v32  ;;  %v1833_v32 = vsel %vm1430_vm14, 1.0, %v1968_v48 }
 0x424   : > { %1511 = vadd.xlane.f32.xlu0 %v1510_v41  ;;  %v1478_v24 = vmul.f32 %v1833_v32, %v2462_v29  ;;  %v1386_v55 = vcvt.f32.s32 %v3004_v38 }
 0x425   : > { %v3075_v15 = vadd.s32 %v1237_v46, %v1235_v18  ;;  %v1486_v40 = vsel %vm552_vm1, %v1468_v7, 0.0 }
 0x426   : > { %1487 = vadd.xlane.f32.xlu1 %v1486_v40  ;;  %v1516_v28 = vsel %vm552_vm1, %v1478_v24, 0.0  ;;  %v1387_v12 = vshll.u32 %v1386_v55, 16 }
 0x427   : > { %vm1422_vm15 = vcmp.eq.s32.totalorder %v2325_v61, %v3075_v15  ;;  %1490 = vadd.xlane.f32.xlu2 %v1489_v4 }
 0x428   : > { %v1339_v0 = vpop.xlane.xlu1 %1338  ;;  %v1825_v44 = vsel %vm1422_vm15, 1.0, %v1968_v48 }
 0x429   : > { %v1340_v47 = vcvt.f32.s32 %v1339_v0  ;;  %v1470_v5 = vmul.f32 %v1825_v44, %v2559_v20 }
 0x42b   : > { %v3086_v39 = vadd.s32 %v1342_v14, %v1340_v47  ;;  %v1492_v26 = vsel %vm552_vm1, %v1470_v5, 0.0  ;;  %v1296_v14 = vcvt.f32.s32 %v3014_v27 }
 0x42c   : > { %1493 = vadd.xlane.f32.xlu0 %v1492_v26 }
 0x42d   : > { %vm1429_vm0 = vcmp.eq.s32.totalorder %v2325_v61, %v3086_v39  ;;  %v1297_v24 = vshll.u32 %v1296_v14, 16 }
 0x42e   : > { %v1832_v34 = vsel %vm1429_vm0, 1.0, %v1968_v48 }
 0x42f   : > { %v1477_v50 = vmul.f32 %v1832_v34, %v2594_v57  ;;  %1517 = vadd.xlane.f32.xlu2 %v1516_v28  ;;  %v1266_v57 = vcvt.f32.s32 %v2998_v52 }
 0x430   : > { %v1249_v20 = vpop.xlane.xlu1 %1248 }
 0x431   : > { %v1250_v16 = vcvt.f32.s32 %v1249_v20  ;;  %v1513_v10 = vsel %vm552_vm1, %v1477_v50, 0.0  ;;  %v1267_v35 = vshll.u32 %v1266_v57, 16 }
 0x432   : > { %1514 = vadd.xlane.f32.xlu1 %v1513_v10 }
 0x433   : > { %v3097_v29 = vadd.s32 %v1252_v63, %v1250_v16 }
 0x435   : > { %vm1423_vm2 = vcmp.eq.s32.totalorder %v2325_v61, %v3097_v29 }
 0x436   : > { %v1826_v17 = vsel %vm1423_vm2, 1.0, %v1968_v48 }
 0x437   : > { %v1471_v25 = vmul.f32 %v1826_v17, %v2606_v45  ;;  %v1371_v45 = vcvt.f32.s32 %v3006_v37  ;;  %v1281_v37 = vcvt.f32.s32 %v3018_v43 }
 0x439   : > { %v1495_v30 = vsel %vm552_vm1, %v1471_v25, 0.0  ;;  %v1372_v40 = vshll.u32 %v1371_v45, 16  ;;  %v1282_v50 = vshll.u32 %v1281_v37, 16  ;;  %v3359_v37 = vld [vmem:[#allocation7_spill] sm:$0xff] }
 0x43a   : > { %1496 = vadd.xlane.f32.xlu1 %v1495_v30  ;;  %v1401_v30 = vcvt.f32.s32 %v3023_v42 }
 0x43f   : > { %v1264_v60 = vpop.xlane.xlu0 %1263 }
 0x440   : > { %v1265_v46 = vcvt.f32.s32 %v1264_v60  ;;  %v1402_v60 = vshll.u32 %v1401_v30, 16 }
 0x442   : > { %v3105_v19 = vadd.s32 %v1267_v35, %v1265_v46 }
 0x444   : > { %vm1424_vm3 = vcmp.eq.s32.totalorder %v2325_v61, %v3105_v19 }
 0x445   : > { %v1827_v18 = vsel %vm1424_vm3, 1.0, %v1968_v48 }
 0x446   : > { %v1472_v41 = vmul.f32 %v1827_v18, %v2635_v2  ;;  %v1416_v18 = vcvt.f32.s32 %v3035_v49 }
 0x448   : > { %v1498_v13 = vsel %vm552_vm1, %v1472_v41, 0.0  ;;  %v1417_v42 = vshll.u32 %v1416_v18, 16 }
 0x449   : > { %1499 = vadd.xlane.f32.xlu2 %v1498_v13  ;;  %v1384_v52 = vpop.xlane.xlu1 %1383  ;;  %v1532_v13 = vcvt.s32.f32 %v3033_v56 }
 0x44a   : > { %v1369_v7 = vpop.xlane.xlu2 %1368  ;;  %v1385_v4 = vcvt.f32.s32 %v1384_v52 }
 0x44b   : > { %v1370_v0 = vcvt.f32.s32 %v1369_v7 }
 0x44c   : > { %v3114_v44 = vadd.s32 %v1387_v12, %v1385_v4  ;;  %v1540_v12 = vcvt.s32.f32 %v3029_v1 }
 0x44d   : > { %v3116_v32 = vadd.s32 %v1372_v40, %v1370_v0 }
 0x44e   : > { %vm1432_vm4 = vcmp.eq.s32.totalorder %v2325_v61, %v3114_v44 }
 0x44f   : > { %vm1431_vm5 = vcmp.eq.s32.totalorder %v2325_v61, %v3116_v32  ;;  %v1835_v2 = vsel %vm1432_vm4, 1.0, %v1968_v48 }
 0x450   : > { %v1834_v38 = vsel %vm1431_vm5, 1.0, %v1968_v48  ;;  %v1480_v47 = vmul.f32 %v1835_v2, %v2682_v23  ;;  %v1533_v2 = vcvt.s32.f32 %v3061_v51 }
 0x451   : > { %v1479_v5 = vmul.f32 %v1834_v38, %v2685_v36  ;;  %v3358_v38 = vld [vmem:[#allocation6_spill] sm:$0xff] }
 0x452   : > { %v1294_v26 = vpop.xlane.xlu1 %1293  ;;  %v1522_v27 = vsel %vm552_vm1, %v1480_v47, 0.0 }
 0x453   : > { %v1295_v11 = vcvt.f32.s32 %v1294_v26  ;;  %v1519_v34 = vsel %vm552_vm1, %v1479_v5, 0.0  ;;  %1523 = vadd.xlane.f32.xlu1 %v1522_v27 }
 0x454   : > { %v1279_v28 = vpop.xlane.xlu2 %1278  ;;  %1520 = vadd.xlane.f32.xlu0 %v1519_v34 }
 0x455   : > { %v3130_v20 = vadd.s32 %v1297_v24, %v1295_v11  ;;  %v1280_v63 = vcvt.f32.s32 %v1279_v28  ;;  %v3361_v11 = vld [vmem:[#allocation4_spill] sm:$0xff] }
 0x456   : > { %v3362_v28 = vld [vmem:[#allocation8_spill] sm:$0xff] }
 0x457   : > { %v3132_v16 = vadd.s32 %v1282_v50, %v1280_v63  ;;  %vm1426_vm8 = vcmp.eq.s32.totalorder %v2325_v61, %v3130_v20 }
 0x458   : > { %v1829_v23 = vsel %vm1426_vm8, 1.0, %v1968_v48 }
 0x459   : > { %v1474_v36 = vmul.f32 %v1829_v23, %v2726_v59  ;;  %vm1425_vm9 = vcmp.eq.s32.totalorder %v2325_v61, %v3132_v16  ;;  %v3363_v23 = vld [vmem:[#allocation2_spill] sm:$0xff] }
 0x45a   : > { %v1828_v43 = vsel %vm1425_vm9, 1.0, %v1968_v48 }
 0x45b   : > { %v1504_v10 = vsel %vm552_vm1, %v1474_v36, 0.0  ;;  %v1473_v17 = vmul.f32 %v1828_v43, %v2741_v31  ;;  %v1543_v36 = vcvt.s32.f32 %v3065_v33 }
 0x45c   : > { %1505 = vadd.xlane.f32.xlu1 %v1504_v10  ;;  %v3364_v10 = vld [vmem:[#allocation5_spill] sm:$0xff] }
 0x45d   : > { %v1501_v25 = vsel %vm552_vm1, %v1473_v17, 0.0 }
 0x45e   : > { %1502 = vadd.xlane.f32.xlu0 %v1501_v25 }
 0x475   : > { %1623 = vperm.xlu1 %1858, %v2286_v3  }
 0x480   : > { %v1399_v57 = vpop.xlane.xlu0 %1398 }
 0x481   : > { %v1400_v59 = vcvt.f32.s32 %v1399_v57  ;;  %v3365_v57 = vld [vmem:[#allocation9_spill] sm:$0xff] }
 0x483   : > { %v3146_v35 = vadd.s32 %v1402_v60, %v1400_v59  ;;  %v3366_v59 = vld [vmem:[#allocation3_spill] sm:$0xff] }
 0x485   : > { %vm1433_vm10 = vcmp.eq.s32.totalorder %v2325_v61, %v3146_v35 }
 0x486   : > { %v1836_v46 = vsel %vm1433_vm10, 1.0, %v1968_v48 }
 0x487   : > { %v1481_v31 = vmul.f32 %v1836_v46, %v2781_v21  ;;  %v1536_v46 = vcvt.s32.f32 %v3097_v29 }
 0x489   : > { %v1525_v41 = vsel %vm552_vm1, %v1481_v31, 0.0  ;;  %v3367_v31 = vld [vmem:[#allocation10_spill] sm:$0xff] }
 0x48a   : > { %1526 = vadd.xlane.f32.xlu2 %v1525_v41  ;;  %v1414_v3 = vpop.xlane.xlu2 %1413 }
 0x48b   : > { %v1415_v55 = vcvt.f32.s32 %v1414_v3  ;;  %v1537_v3 = vcvt.s32.f32 %v3105_v19 }
 0x48d   : > { %v3155_v45 = vadd.s32 %v1417_v42, %v1415_v55  ;;  %v3368_v55 = vld [vmem:[#allocation12_spill] sm:$0xff] }
 0x48f   : > { %v1485_v21 = vpop.xlane.xlu0 %1484  ;;  %vm1434_vm13 = vcmp.eq.s32.totalorder %v2325_v61, %v3155_v45 }
 0x490   : > { %v1663_v49 = vsel %vm1548_vm11, %v1485_v21, %v2476_v8  ;;  %v1837_v56 = vsel %vm1434_vm13, 1.0, %v1968_v48  ;;  %v1541_v48 = vcvt.s32.f32 %v3053_v58  ;;  %v3360_v58 = vsub.f32 %v3358_v38, %v3359_v37 }
 0x491   : > { %v1679_v52 = vsel %vm1531_vm12, %v1532_v13, %v1663_v49  ;;  %v1482_v7 = vmul.f32 %v1837_v56, %v2826_v6  ;;  %v1544_v21 = vcvt.s32.f32 %v3116_v32  ;;  %v1538_v32 = vcvt.s32.f32 %v3132_v16 }
 0x492   : > { %1695 = vst [vmem:[%s3163_s30] sm:$0xff] %v1679_v52  ;;  %v1509_v40 = vpop.xlane.xlu2 %1508  ;;  %v1546_v16 = vcvt.s32.f32 %v3146_v35  ;;  %v1545_v35 = vcvt.s32.f32 %v3114_v44  ;;  %v1547_v44 = vcvt.s32.f32 %v3155_v45 }
 0x493   : > { %v1671_v4 = vsel %vm1548_vm11, %v1509_v40, %v2352_v22  ;;  %v1528_v8 = vsel %vm552_vm1, %v1482_v7, 0.0  ;;  %v1632_v22 = vsel %vm1550_vm6, %v2208_v62, 0.0  ;;  %v1539_v7 = vcvt.s32.f32 %v3130_v20  ;;  %v3369_v40 = vld [vmem:[#allocation14_spill] sm:$0xff] }
 0x494   : > { %v1687_v0 = vsel %vm1531_vm12, %v1540_v12, %v1671_v4  ;;  %1529 = vadd.xlane.f32.xlu0 %v1528_v8  ;;  %v1648_v47 = vsel %vm1549_vm7, %v3360_v58, %v1632_v22  ;;  %v3371_v22 = vld [vmem:[#allocation16_spill] sm:$0xff] }
 0x495   : > { %1703 = vst [vmem:[%s3163_s30 + $0x40] sm:$0xff] %v1687_v0 }
 0x497   : > { %v1512_v14 = vpop.xlane.xlu0 %1511 }
 0x498   : > { %v1672_v6 = vsel %vm1548_vm11, %v1512_v14, %v2570_v53  ;;  %v1534_v53 = vcvt.s32.f32 %v3046_v54  ;;  %v1535_v54 = vcvt.s32.f32 %v3075_v15  ;;  %v1542_v15 = vcvt.s32.f32 %v3086_v39 }
 0x499   : > { %v1688_v1 = vsel %vm1531_vm12, %v1541_v48, %v1672_v6  ;;  %v1488_v5 = vpop.xlane.xlu1 %1487 }
 0x49a   : > { %1704 = vst [vmem:[%s3163_s30 + $0x48] sm:$0xff] %v1688_v1  ;;  %v1664_v26 = vsel %vm1548_vm11, %v1488_v5, %v1648_v47  ;;  %v1491_v62 = vpop.xlane.xlu2 %1490  ;;  %v3372_v1 = vld [vmem:[#allocation17_spill] sm:$0xff] }
 0x49b   : > { %v1680_v24 = vsel %vm1531_vm12, %v1533_v2, %v1664_v26  ;;  %v1665_v51 = vsel %vm1548_vm11, %v1491_v62, %v3361_v11  ;;  %v3373_v2 = vsub.f32 %v3371_v22, %v3372_v1  ;;  %v3374_v26 = vld [vmem:[#allocation11_spill] sm:$0xff]  ;;  %v3375_v62 = vld [vmem:[#allocation13_spill] sm:$0xff] }
 0x49c   : > { %1696 = vst [vmem:[%s3163_s30 + $0x8] sm:$0xff] %v1680_v24  ;;  %v1681_v27 = vsel %vm1531_vm12, %v1534_v53, %v1665_v51  ;;  %v3376_v24 = vsub.f32 %v3374_v26, %v3375_v62 }
 0x49d   : > { %1697 = vst [vmem:[%s3163_s30 + $0x10] sm:$0xff] %v1681_v27 }
 0x49f   : > { %v1494_v34 = vpop.xlane.xlu0 %1493 }
 0x4a0   : > { %v1666_v50 = vsel %vm1548_vm11, %v1494_v34, %v3362_v28 }
 0x4a1   : > { %v1682_v63 = vsel %vm1531_vm12, %v1535_v54, %v1666_v50  ;;  %v3377_v50 = vld [vmem:[#allocation18_spill] sm:$0xff] }
 0x4a2   : > { %1698 = vst [vmem:[%s3163_s30 + $0x18] sm:$0xff] %v1682_v63  ;;  %1618 = vperm.xlu2 %1859, %v3363_v23   ;;  %v1518_v43 = vpop.xlane.xlu2 %1517  ;;  %v3378_v63 = vld [vmem:[#allocation19_spill] sm:$0xff] }
 0x4a3   : > { %v1674_v17 = vsel %vm1548_vm11, %v1518_v43, %v3364_v10  ;;  %v3379_v23 = vsub.f32 %v3377_v50, %v3378_v63 }
 0x4a4   : > { %v1690_v25 = vsel %vm1531_vm12, %v1543_v36, %v1674_v17 }
 0x4a5   : > { %v1515_v30 = vpop.xlane.xlu1 %1514  ;;  %1706 = vst [vmem:[%s3163_s30 + $0x58] sm:$0xff] %v1690_v25 }
 0x4a6   : > { %v1673_v60 = vsel %vm1548_vm11, %v1515_v30, %v3365_v57 }
 0x4a7   : > { %v1689_v33 = vsel %vm1531_vm12, %v1542_v15, %v1673_v60 }
 0x4a8   : > { %1705 = vst [vmem:[%s3163_s30 + $0x50] sm:$0xff] %v1689_v33  ;;  %1628 = vperm.xlu0 %1860, %v3366_v59  }
 0x4ad   : > { %v1497_v39 = vpop.xlane.xlu1 %1496 }
 0x4ae   : > { %v1667_v18 = vsel %vm1548_vm11, %v1497_v39, %v3367_v31 }
 0x4af   : > { %v1683_v41 = vsel %vm1531_vm12, %v1536_v46, %v1667_v18 }
 0x4b0   : > { %1699 = vst [vmem:[%s3163_s30 + $0x20] sm:$0xff] %v1683_v41 }
 0x4bc   : > { %v1500_v42 = vpop.xlane.xlu2 %1499 }
 0x4bd   : > { %v1668_v13 = vsel %vm1548_vm11, %v1500_v42, %v3368_v55 }
 0x4be   : > { %v1684_v29 = vsel %vm1531_vm12, %v1537_v3, %v1668_v13 }
 0x4bf   : > { %1700 = vst [vmem:[%s3163_s30 + $0x28] sm:$0xff] %v1684_v29 }
 0x4c6   : > { %v1524_v49 = vpop.xlane.xlu1 %1523 }
 0x4c7   : > { %v1521_v52 = vpop.xlane.xlu0 %1520 }
 0x4c8   : > { %v1675_v56 = vsel %vm1548_vm11, %v1521_v52, %v2731_v9  ;;  %v3370_v9 = vld [vmem:[#allocation15_spill] sm:$0xff] }
 0x4c9   : > { %v1691_v19 = vsel %vm1531_vm12, %v1544_v21, %v1675_v56 }
 0x4ca   : > { %1707 = vst [vmem:[%s3163_s30 + $0x60] sm:$0xff] %v1691_v19 }
 0x4cf   : > { %v1506_v12 = vpop.xlane.xlu1 %1505 }
 0x4d0   : > { %v1670_v4 = vsel %vm1548_vm11, %v1506_v12, %v3369_v40 }
 0x4d1   : > { %v1686_v8 = vsel %vm1531_vm12, %v1539_v7, %v1670_v4  ;;  %v1503_v0 = vpop.xlane.xlu0 %1502 }
 0x4d2   : > { %1702 = vst [vmem:[%s3163_s30 + $0x38] sm:$0xff] %v1686_v8  ;;  %v1669_v48 = vsel %vm1548_vm11, %v1503_v0, %v3370_v9 }
 0x4d3   : > { %v1685_v20 = vsel %vm1531_vm12, %v1538_v32, %v1669_v48 }
 0x4d4   : > { %1701 = vst [vmem:[%s3163_s30 + $0x30] sm:$0xff] %v1685_v20 }
 0x4e7   : > { %v1624_v14 = vpop.permute.xlu1 %1623 }
 0x4e8   : > { %v1645_v6 = vsel %vm1550_vm6, %v1624_v14, 0.0 }
 0x4e9   : > { %v1661_v38 = vsel %vm1549_vm7, %v3373_v2, %v1645_v6 }
 0x4fd   : > { %v1527_v37 = vpop.xlane.xlu2 %1526 }
 0x4fe   : > { %v1677_v58 = vsel %vm1548_vm11, %v1527_v37, %v1661_v38 }
 0x4ff   : > { %v1693_v47 = vsel %vm1531_vm12, %v1546_v16, %v1677_v58 }
 0x500   : > { %1709 = vst [vmem:[%s3163_s30 + $0x70] sm:$0xff] %v1693_v47 }
 0x505   : > { %v1619_v5 = vpop.permute.xlu2 %1618 }
 0x506   : > { %v1644_v53 = vsel %vm1550_vm6, %v1619_v5, 0.0 }
 0x507   : > { %v1660_v11 = vsel %vm1549_vm7, %v3376_v24, %v1644_v53  ;;  %v1530_v54 = vpop.xlane.xlu0 %1529 }
 0x508   : > { %v1676_v51 = vsel %vm1548_vm11, %v1524_v49, %v1660_v11 }
 0x509   : > { %v1692_v27 = vsel %vm1531_vm12, %v1545_v35, %v1676_v51 }
 0x50a   : > { %1708 = vst [vmem:[%s3163_s30 + $0x68] sm:$0xff] %v1692_v27 }
 0x51a   : > { %v1629_v34 = vpop.permute.xlu0 %1628 }
 0x51b   : > { %v1646_v28 = vsel %vm1550_vm6, %v1629_v34, 0.0 }
 0x51c   : > { %v1662_v36 = vsel %vm1549_vm7, %v3379_v23, %v1646_v28 }
 0x51d   : > { %v1678_v43 = vsel %vm1548_vm11, %v1530_v54, %v1662_v36 }
 0x51e   : > { %v1694_v10 = vsel %vm1531_vm12, %v1547_v44, %v1678_v43 }
 0x51f   : > { %1710 = vst [vmem:[%s3163_s30 + $0x78] sm:$0xff] %v1694_v10 }
 0x520 PF: > { %s16_s21 = sadd.s32 1, %s1965_s21  }
 0x521   : > { %p13_p4 = scmp.ge.s32.totalorder %s16_s21, 4  }
 0x523   :  { %15 = sbr.rel (!%p13_p4) target bundleno = 1 (0x1), region = 77 }

</bundles_post_ra>
